<compile_context>
chip_gen: v7x
topology: tpu7x:2x2x1
jax: 0.10.0
libtpu: 0.0.40
codegen_flags: <defaults>
</compile_context>

<pallas_src>
import jax
import jax.numpy as jnp
from jax.experimental import pallas as pl
from jax.experimental.pallas import tpu as pltpu

HIDDEN1 = 1024
HIDDEN2 = 512
LANE = 128
MAX_TM = 512  # row-tile cap; ~8 MiB VMEM footprint incl. double buffering


def _round_up(n, m):
    return ((n + m - 1) // m) * m


def _mlp_kernel(x_ref, w1_ref, b1_ref, w2_ref, b2_ref, w3_ref, b3_ref, o_ref):
    # x tile is f32; cast to bf16 in-register so all three matmuls run
    # bf16 x bf16 on the MXU with f32 accumulation.
    x = x_ref[...].astype(jnp.bfloat16)

    # Fuse the bf16 downcast into the ReLU: only the bf16 activation tensor
    # stays live past each layer (the f32 accumulator dies immediately).
    h1 = jnp.dot(x, w1_ref[...], preferred_element_type=jnp.float32)
    h1 = jnp.maximum(h1 + b1_ref[...], 0.0).astype(jnp.bfloat16)

    h2 = jnp.dot(h1, w2_ref[...], preferred_element_type=jnp.float32)
    h2 = jnp.maximum(h2 + b2_ref[...], 0.0).astype(jnp.bfloat16)

    out = jnp.dot(h2, w3_ref[...], preferred_element_type=jnp.float32)
    o_ref[...] = (out + b3_ref[...]).astype(o_ref.dtype)


def prepare_params(params):
    """One-time prep: transpose weights to (in, out), cast to bf16, pad fc3
    outputs up to a multiple of 128 lanes. Done once, NOT per forward call."""
    action_dim = params["w3"].shape[0]
    out_pad = max(LANE, _round_up(action_dim, LANE))

    w1_t = params["w1"].T.astype(jnp.bfloat16)                      # (state, 1024)
    w2_t = params["w2"].T.astype(jnp.bfloat16)                      # (1024, 512)
    w3_t = jnp.pad(params["w3"].T,
                   ((0, 0), (0, out_pad - action_dim))).astype(jnp.bfloat16)

    b1 = params["b1"].astype(jnp.float32).reshape(1, -1)            # (1, 1024)
    b2 = params["b2"].astype(jnp.float32).reshape(1, -1)            # (1, 512)
    b3 = jnp.pad(params["b3"].astype(jnp.float32),
                 (0, out_pad - action_dim)).reshape(1, -1)          # (1, out_pad)

    return {"w1_t": w1_t, "b1": b1,
            "w2_t": w2_t, "b2": b2,
            "w3_t": w3_t, "b3": b3,
            "action_dim": action_dim, "out_pad": out_pad}


def _row_tile(B):
    """Pick the per-step row tile. Sublane-aligned (multiple of 8) when
    possible so output stores are unmasked; tiny batches use the full row
    extent (always a legal block shape)."""
    if B >= MAX_TM:
        return MAX_TM
    if B >= 8:
        return _round_up(B, 8)   # single (possibly masked-at-the-tail) block
    return B


def net_forward(x, prepped, *, core_parallel=False):
    """x: (B, state_dim) float32. prepped: output of prepare_params.

    core_parallel=True shards the batch-tile axis across both v7x
    TensorCores (use only on v7x and when B >= 2*MAX_TM)."""
    B, state_dim = x.shape
    action_dim = prepped["action_dim"]
    out_pad = prepped["out_pad"]

    tm = _row_tile(B)
    grid = (pl.cdiv(B, tm),)

    # Weights / biases: constant index_map -> fetched once, VMEM resident.
    const = lambda shape: pl.BlockSpec(shape, lambda i: (0, 0))

    if core_parallel and grid[0] >= 2:
        batch_sem = pltpu.CORE_PARALLEL      # v7x: shard tiles across 2 TCs
    else:
        batch_sem = pltpu.PARALLEL

    out_padded = pl.pallas_call(
        _mlp_kernel,
        out_shape=jax.ShapeDtypeStruct((B, out_pad), jnp.float32),
        grid=grid,
        in_specs=[
            pl.BlockSpec((tm, state_dim), lambda i: (i, 0)),   # x row tile
            const((state_dim, HIDDEN1)),                       # w1 (VMEM resident)
            const((1, HIDDEN1)),                               # b1
            const((HIDDEN1, HIDDEN2)),                         # w2
            const((1, HIDDEN2)),                               # b2
            const((HIDDEN2, out_pad)),                         # w3 (padded lanes)
            const((1, out_pad)),                               # b3
        ],
        out_specs=pl.BlockSpec((tm, out_pad), lambda i: (i, 0)),
        compiler_params=pltpu.CompilerParams(
            dimension_semantics=(batch_sem,),
            vmem_limit_bytes=32 << 20,
        ),
    )(x, prepped["w1_t"], prepped["b1"],
      prepped["w2_t"], prepped["b2"],
      prepped["w3_t"], prepped["b3"])

    return out_padded[:, :action_dim]


def init_params(key, state_dim, action_dim):
    """Deterministic synthetic init with PyTorch nn.Linear weight shapes."""
    ks = jax.random.split(key, 6)

    def linear(kw, kb, fan_in, fan_out):
        bound = 1.0 / jnp.sqrt(jnp.float32(fan_in))
        w = jax.random.uniform(kw, (fan_out, fan_in), jnp.float32, -bound, bound)
        b = jax.random.uniform(kb, (fan_out,), jnp.float32, -bound, bound)
        return w, b

    w1, b1 = linear(ks[0], ks[1], state_dim, HIDDEN1)
    w2, b2 = linear(ks[2], ks[3], HIDDEN1, HIDDEN2)
    w3, b3 = linear(ks[4], ks[5], HIDDEN2, action_dim)
    return {"w1": w1, "b1": b1, "w2": w2, "b2": b2, "w3": w3, "b3": b3}


def reference_forward_f32(x, p):
    """Original PyTorch-module semantics in f32."""
    h1 = jnp.maximum(x @ p["w1"].T + p["b1"], 0.0)
    h2 = jnp.maximum(h1 @ p["w2"].T + p["b2"], 0.0)
    return h2 @ p["w3"].T + p["b3"]


def reference_forward_bf16(x, prepped):
    """Same bf16-weight / bf16-activation recipe as the kernel
    (tight-tolerance check)."""
    xb = x.astype(jnp.bfloat16)
    h1 = jnp.dot(xb, prepped["w1_t"], preferred_element_type=jnp.float32)
    h1 = jnp.maximum(h1 + prepped["b1"], 0.0).astype(jnp.bfloat16)
    h2 = jnp.dot(h1, prepped["w2_t"], preferred_element_type=jnp.float32)
    h2 = jnp.maximum(h2 + prepped["b2"], 0.0).astype(jnp.bfloat16)
    out = jnp.dot(h2, prepped["w3_t"],
                  preferred_element_type=jnp.float32) + prepped["b3"]
    return out[:, :prepped["action_dim"]]


if __name__ == "__main__":
    state_dim = 16
    action_dim = 5
    batch = 2

    key = jax.random.PRNGKey(0)
    k_params, k_x = jax.random.split(key)

    params = init_params(k_params, state_dim, action_dim)
    prepped = prepare_params(params)
    x = jax.random.normal(k_x, (batch, state_dim), jnp.float32)

    out = net_forward(x, prepped)
    out = jax.block_until_ready(out)
    assert out.shape == (batch, action_dim)

    # Tight check vs. a reference using the exact same bf16 recipe.
    ref_bf16 = reference_forward_bf16(x, prepped)
    assert jnp.allclose(out, ref_bf16, atol=1e-3, rtol=1e-3)

    # Looser check vs. the original f32 module semantics (bf16 weight cast
    # changes numerics slightly).
    ref_f32 = reference_forward_f32(x, params)
    assert jnp.allclose(out, ref_f32, atol=2e-2, rtol=2e-2)

    print("KERNEL_OK")
</pallas_src>

<mosaic_0001>
module attributes {stable_mosaic.version = 11 : i64} {
  func.func @_mlp_kernel(%arg0: i32, %arg1: memref<2x16xf32, #tpu.memory_space<vmem>>, %arg2: memref<16x1024xbf16, #tpu.memory_space<vmem>>, %arg3: memref<1x1024xf32, #tpu.memory_space<vmem>>, %arg4: memref<1024x512xbf16, #tpu.memory_space<vmem>>, %arg5: memref<1x512xf32, #tpu.memory_space<vmem>>, %arg6: memref<512x128xbf16, #tpu.memory_space<vmem>>, %arg7: memref<1x128xf32, #tpu.memory_space<vmem>>, %arg8: memref<2x128xf32, #tpu.memory_space<vmem>>) attributes {dimension_semantics = [#tpu.dimension_semantics<parallel>], iteration_bounds = array<i64: 1>, scalar_prefetch = 0 : i64, scratch_operands = 0 : i64, tpu.core_type = #tpu.core_type<tc>, window_params = [{transform_indices = @transform_0, window_bounds = array<i64: 2, 16>}, {pipeline_mode = #tpu.pipeline_mode<synchronous>, transform_indices = @transform_1, window_bounds = array<i64: 16, 1024>}, {pipeline_mode = #tpu.pipeline_mode<synchronous>, transform_indices = @transform_2, window_bounds = array<i64: 1, 1024>}, {pipeline_mode = #tpu.pipeline_mode<synchronous>, transform_indices = @transform_3, window_bounds = array<i64: 1024, 512>}, {pipeline_mode = #tpu.pipeline_mode<synchronous>, transform_indices = @transform_4, window_bounds = array<i64: 1, 512>}, {pipeline_mode = #tpu.pipeline_mode<synchronous>, transform_indices = @transform_5, window_bounds = array<i64: 512, 128>}, {pipeline_mode = #tpu.pipeline_mode<synchronous>, transform_indices = @transform_6, window_bounds = array<i64: 1, 128>}, {transform_indices = @transform_7, window_bounds = array<i64: 2, 128>}]} {
    %c0 = arith.constant 0 : index
    %c0_0 = arith.constant 0 : index
    %0 = vector.load %arg1[%c0, %c0_0] : memref<2x16xf32, #tpu.memory_space<vmem>>, vector<2x16xf32>
    %1 = arith.truncf %0 : vector<2x16xf32> to vector<2x16xbf16>
    %c0_1 = arith.constant 0 : index
    %c0_2 = arith.constant 0 : index
    %2 = vector.load %arg2[%c0_1, %c0_2] : memref<16x1024xbf16, #tpu.memory_space<vmem>>, vector<16x1024xbf16>
    %cst = arith.constant dense<0.000000e+00> : vector<2x1024xf32>
    %3 = tpu.matmul %1, %2, %cst {dimension_numbers = #tpu.dot_dimension_numbers<[1], [0], [0], [1], [0, 0, 1, 1], [], []>} : vector<2x16xbf16>, vector<16x1024xbf16>, vector<2x1024xf32> -> vector<2x1024xf32>
    %c0_3 = arith.constant 0 : index
    %c0_4 = arith.constant 0 : index
    %4 = vector.load %arg3[%c0_3, %c0_4] : memref<1x1024xf32, #tpu.memory_space<vmem>>, vector<1x1024xf32>
    %5 = vector.broadcast %4 : vector<1x1024xf32> to vector<2x1024xf32>
    %6 = arith.addf %3, %5 : vector<2x1024xf32>
    %cst_5 = arith.constant 0.000000e+00 : f32
    %7 = vector.broadcast %cst_5 : f32 to vector<2x1024xf32>
    %8 = arith.maximumf %6, %7 : vector<2x1024xf32>
    %9 = arith.truncf %8 : vector<2x1024xf32> to vector<2x1024xbf16>
    %c0_6 = arith.constant 0 : index
    %c0_7 = arith.constant 0 : index
    %10 = vector.load %arg4[%c0_6, %c0_7] : memref<1024x512xbf16, #tpu.memory_space<vmem>>, vector<1024x512xbf16>
    %cst_8 = arith.constant dense<0.000000e+00> : vector<2x512xf32>
    %11 = tpu.matmul %9, %10, %cst_8 {dimension_numbers = #tpu.dot_dimension_numbers<[1], [0], [0], [1], [0, 0, 1, 1], [], []>} : vector<2x1024xbf16>, vector<1024x512xbf16>, vector<2x512xf32> -> vector<2x512xf32>
    %c0_9 = arith.constant 0 : index
    %c0_10 = arith.constant 0 : index
    %12 = vector.load %arg5[%c0_9, %c0_10] : memref<1x512xf32, #tpu.memory_space<vmem>>, vector<1x512xf32>
    %13 = vector.broadcast %12 : vector<1x512xf32> to vector<2x512xf32>
    %14 = arith.addf %11, %13 : vector<2x512xf32>
    %cst_11 = arith.constant 0.000000e+00 : f32
    %15 = vector.broadcast %cst_11 : f32 to vector<2x512xf32>
    %16 = arith.maximumf %14, %15 : vector<2x512xf32>
    %17 = arith.truncf %16 : vector<2x512xf32> to vector<2x512xbf16>
    %c0_12 = arith.constant 0 : index
    %c0_13 = arith.constant 0 : index
    %18 = vector.load %arg6[%c0_12, %c0_13] : memref<512x128xbf16, #tpu.memory_space<vmem>>, vector<512x128xbf16>
    %cst_14 = arith.constant dense<0.000000e+00> : vector<2x128xf32>
    %19 = tpu.matmul %17, %18, %cst_14 {dimension_numbers = #tpu.dot_dimension_numbers<[1], [0], [0], [1], [0, 0, 1, 1], [], []>} : vector<2x512xbf16>, vector<512x128xbf16>, vector<2x128xf32> -> vector<2x128xf32>
    %c0_15 = arith.constant 0 : index
    %c0_16 = arith.constant 0 : index
    %20 = vector.load %arg7[%c0_15, %c0_16] : memref<1x128xf32, #tpu.memory_space<vmem>>, vector<1x128xf32>
    %21 = vector.broadcast %20 : vector<1x128xf32> to vector<2x128xf32>
    %22 = arith.addf %19, %21 : vector<2x128xf32>
    %c0_17 = arith.constant 0 : index
    %c0_18 = arith.constant 0 : index
    %23 = vector.load %arg8[%c0_17, %c0_18] : memref<2x128xf32, #tpu.memory_space<vmem>>, vector<2x128xf32>
    tpu.vector_store %arg8[%c0_17, %c0_18], %22 {strides = array<i32>} : memref<2x128xf32, #tpu.memory_space<vmem>>, vector<2x128xf32>,
    return
  }
  func.func @transform_0(%arg0: i32) -> (i32, i32) {
    %c0_i32 = arith.constant 0 : i32
    %c0_i32_0 = arith.constant 0 : i32
    return %arg0, %c0_i32 : i32, i32
  }
  func.func @transform_1(%arg0: i32) -> (i32, i32) {
    %c0_i32 = arith.constant 0 : i32
    %c0_i32_0 = arith.constant 0 : i32
    %c0_i32_1 = arith.constant 0 : i32
    return %c0_i32, %c0_i32_0 : i32, i32
  }
  func.func @transform_2(%arg0: i32) -> (i32, i32) {
    %c0_i32 = arith.constant 0 : i32
    %c0_i32_0 = arith.constant 0 : i32
    %c0_i32_1 = arith.constant 0 : i32
    return %c0_i32, %c0_i32_0 : i32, i32
  }
  func.func @transform_3(%arg0: i32) -> (i32, i32) {
    %c0_i32 = arith.constant 0 : i32
    %c0_i32_0 = arith.constant 0 : i32
    %c0_i32_1 = arith.constant 0 : i32
    return %c0_i32, %c0_i32_0 : i32, i32
  }
  func.func @transform_4(%arg0: i32) -> (i32, i32) {
    %c0_i32 = arith.constant 0 : i32
    %c0_i32_0 = arith.constant 0 : i32
    %c0_i32_1 = arith.constant 0 : i32
    return %c0_i32, %c0_i32_0 : i32, i32
  }
  func.func @transform_5(%arg0: i32) -> (i32, i32) {
    %c0_i32 = arith.constant 0 : i32
    %c0_i32_0 = arith.constant 0 : i32
    %c0_i32_1 = arith.constant 0 : i32
    return %c0_i32, %c0_i32_0 : i32, i32
  }
  func.func @transform_6(%arg0: i32) -> (i32, i32) {
    %c0_i32 = arith.constant 0 : i32
    %c0_i32_0 = arith.constant 0 : i32
    %c0_i32_1 = arith.constant 0 : i32
    return %c0_i32, %c0_i32_0 : i32, i32
  }
  func.func @transform_7(%arg0: i32) -> (i32, i32) {
    %c0_i32 = arith.constant 0 : i32
    %c0_i32_0 = arith.constant 0 : i32
    return %arg0, %c0_i32 : i32, i32
  }
}

</mosaic_0001>

<bundles_post_ra>
// kernel: tpu_custom_call.1
= control target key start
LH: loop header
LB: loop body
LE: loop exit
PB: predicated region body
PF: predicated region fallthrough
CT: control target
= control target key end

     0   :  { %12 = vsyncpa [#allocation3], 0  ;;  %s3751_s0 = inlined_call_operand.hbm [shape: f32[2,16], index: 0, kind: input, shape index: {}]   ;;  %s3752_s1 = inlined_call_operand.hbm [shape: bf16[16,1024], index: 1, kind: input, shape index: {}]   ;;  %s3753_s2 = inlined_call_operand.hbm [shape: f32[1,1024], index: 2, kind: input, shape index: {}]   ;;  %s3754_s3 = inlined_call_operand.hbm [shape: bf16[1024,512], index: 3, kind: input, shape index: {}]   ;;  %s3755_s4 = inlined_call_operand.vmem [shape: f32[1,512], index: 4, kind: input, shape index: {}]   ;;  %s3756_s5 = inlined_call_operand.hbm [shape: bf16[512,128], index: 5, kind: input, shape index: {}]   ;;  %s3757_s6 = inlined_call_operand.vmem [shape: f32[1,128], index: 6, kind: input, shape index: {}]   ;;  %s3758_s7 = inlined_call_operand.hbm [shape: f32[2,128], index: 7, kind: output, shape index: {}]  }
   0x1   :  { %13 = vsyncpa [#allocation6], 0 }
   0x2   :  { %14 = vsyncpa [#allocation9], 0 }
   0x3   :  { %15 = vsyncpa [#allocation4], 0  ;;  %s3565_s24 = smov [#allocation5]   ;;  %s3425_s28 = scalar_lea.hbm %s3752_s1, 1024 }
   0x4   :  { %s31_s25 = sshll.u32 %s3565_s24, 4  ;;  %p3426_p0 = scmp.ne.s32.totalorder %s3752_s1, %s3425_s28  ;;  %s32_s25 = int_to_ptr.vmem [resolvable:$true] %s31_s25 }
   0x5   :  { %p3429_p1 = scmp.lt.u32.totalorder %s3425_s28, %s3752_s1 }
   0x7   :  { %p3431_p2 = pnand %p3429_p1, %p3426_p0 }
   0x9   :  { %3434 = shalt.err (!%p3431_p2)
}
   0xa   :  { %s3435_s10 = scalar_lea.vmem %s32_s25, 1024  ;;  %p3440_p4 = scmp.lt.s32.totalorder %s32_s25, %s32_s25 }
   0xb   :  { %p3436_p3 = scmp.ne.s32.totalorder %s32_s25, %s3435_s10  ;;  %p3441_p5 = scmp.lt.s32.totalorder %s3435_s10, %s3435_s10 }
   0xd   :  { %p3442_p6 = por %p3441_p5, %p3440_p4 }
   0xf   :  { %p3443_p7 = pnand %p3442_p6, %p3436_p3 }
  0x11   :  { %3446 = shalt.err (!%p3443_p7)
}
  0x12   :  { %s3566_s11 = smov 512   ;;  %s3567_s12 = smov 32  }
  0x13   :  { %37 = dma.hbm_to_vmem [thread:$0]  %s3752_s1, 1024, %s32_s25, [#allocation6], %s3566_s11, %s3566_s11, %s3567_s12  }
  0x14   :  { %s3568_s15 = smov [#allocation8]   ;;  %s3447_s19 = scalar_lea.hbm %s3754_s3, 32768 }
  0x15   :  { %s53_s16 = sshll.u32 %s3568_s15, 4  ;;  %p3448_p8 = scmp.ne.s32.totalorder %s3754_s3, %s3447_s19  ;;  %s54_s16 = int_to_ptr.vmem [resolvable:$true] %s53_s16 }
  0x16   :  { %p3451_p9 = scmp.lt.u32.totalorder %s3447_s19, %s3754_s3 }
  0x18   :  { %p3453_p10 = pnand %p3451_p9, %p3448_p8 }
  0x1a   :  { %3456 = shalt.err (!%p3453_p10)
}
  0x1b   :  { %s3457_s24 = scalar_lea.vmem %s54_s16, 32768  ;;  %p3462_p12 = scmp.lt.s32.totalorder %s54_s16, %s54_s16 }
  0x1c   :  { %p3458_p11 = scmp.ne.s32.totalorder %s54_s16, %s3457_s24  ;;  %p3463_p13 = scmp.lt.s32.totalorder %s3457_s24, %s3457_s24 }
  0x1e   :  { %p3464_p0 = por %p3463_p13, %p3462_p12 }
  0x20   :  { %p3465_p1 = pnand %p3464_p0, %p3458_p11 }
  0x22   :  { %3468 = shalt.err (!%p3465_p1)
}
  0x23   :  { %s3569_s1 = smov 256   ;;  %s3570_s25 = smov 16  }
  0x24   :  { %59 = dma.hbm_to_vmem [thread:$0]  %s3754_s3, 32768, %s54_s16, [#allocation9], %s3569_s1, %s3569_s1, %s3570_s25  }
  0x25   :  { %s3571_s28 = smov [#allocation2]   ;;  %s3572_s30 = smov [#allocation7]  }
  0x26   :  { %s22_s29 = sshll.u32 %s3571_s28, 4  ;;  %s44_s8 = sshll.u32 %s3572_s30, 4  ;;  %s23_s29 = int_to_ptr.vmem [resolvable:$true] %s22_s29  ;;  %s45_s8 = int_to_ptr.vmem [resolvable:$true] %s44_s8 }
  0x27   :  { %s3469_s11 = scalar_lea.hbm %s3751_s0, 32 }
  0x28   :  { %p3470_p2 = scmp.ne.s32.totalorder %s3751_s0, %s3469_s11  ;;  %p3473_p3 = scmp.lt.u32.totalorder %s3469_s11, %s3751_s0 }
  0x2a   :  { %p3475_p4 = pnand %p3473_p3, %p3470_p2 }
  0x2c   :  { %3478 = shalt.err (!%p3475_p4)
}
  0x2d   :  { %s3479_s3 = scalar_lea.vmem %s23_s29, 32  ;;  %p3484_p6 = scmp.lt.s32.totalorder %s23_s29, %s23_s29 }
  0x2e   :  { %p3480_p5 = scmp.ne.s32.totalorder %s23_s29, %s3479_s3  ;;  %p3485_p7 = scmp.lt.s32.totalorder %s3479_s3, %s3479_s3 }
  0x30   :  { %p3486_p8 = por %p3485_p7, %p3484_p6 }
  0x32   :  { %p3487_p9 = pnand %p3486_p8, %p3480_p5 }
  0x34   :  { %3490 = shalt.err (!%p3487_p9)
}
  0x35   :  { %25 = dma.hbm_to_vmem [thread:$0]  %s3751_s0, 32, %s23_s29, [#allocation3]  }
  0x36   :  { %s3491_s20 = scalar_lea.hbm %s3753_s2, 128 }
  0x37   :  { %p3492_p10 = scmp.ne.s32.totalorder %s3753_s2, %s3491_s20  ;;  %p3495_p11 = scmp.lt.u32.totalorder %s3491_s20, %s3753_s2 }
  0x39   :  { %p3497_p12 = pnand %p3495_p11, %p3492_p10 }
  0x3b   :  { %3500 = shalt.err (!%p3497_p12)
}
  0x3c   :  { %s3501_s1 = scalar_lea.vmem %s45_s8, 128  ;;  %p3506_p0 = scmp.lt.s32.totalorder %s45_s8, %s45_s8 }
  0x3d   :  { %p3502_p13 = scmp.ne.s32.totalorder %s45_s8, %s3501_s1  ;;  %p3507_p1 = scmp.lt.s32.totalorder %s3501_s1, %s3501_s1 }
  0x3f   :  { %p3508_p2 = por %p3507_p1, %p3506_p0 }
  0x41   :  { %p3509_p3 = pnand %p3508_p2, %p3502_p13 }
  0x43   :  { %3512 = shalt.err (!%p3509_p3)
}
  0x44   :  { %47 = dma.hbm_to_vmem [thread:$0]  %s3753_s2, 128, %s45_s8, [#allocation6]  }
  0x45   :  { %s3573_s26 = smov [#allocation10]   ;;  %s3513_s30 = scalar_lea.hbm %s3756_s5, 4096 }
  0x46   :  { %s67_s27 = sshll.u32 %s3573_s26, 4  ;;  %p3514_p4 = scmp.ne.s32.totalorder %s3756_s5, %s3513_s30  ;;  %s68_s27 = int_to_ptr.vmem [resolvable:$true] %s67_s27 }
  0x47   :  { %p3517_p5 = scmp.lt.u32.totalorder %s3513_s30, %s3756_s5 }
  0x49   :  { %p3519_p6 = pnand %p3517_p5, %p3514_p4 }
  0x4b   :  { %3522 = shalt.err (!%p3519_p6)
}
  0x4c   :  { %s3523_s13 = scalar_lea.vmem %s68_s27, 4096  ;;  %p3528_p8 = scmp.lt.s32.totalorder %s68_s27, %s68_s27 }
  0x4d   :  { %p3524_p7 = scmp.ne.s32.totalorder %s68_s27, %s3523_s13  ;;  %p3529_p9 = scmp.lt.s32.totalorder %s3523_s13, %s3523_s13 }
  0x4f   :  { %p3530_p10 = por %p3529_p9, %p3528_p8 }
  0x51   :  { %p3531_p11 = pnand %p3530_p10, %p3524_p7 }
  0x53   :  { %3534 = shalt.err (!%p3531_p11)
}
  0x54   :  { %s3574_s2 = smov 64   ;;  %s3575_s8 = smov 4  }
  0x55   :  { %73 = dma.hbm_to_vmem [thread:$0]  %s3756_s5, 4096, %s68_s27, [#allocation9], %s3574_s2, %s3574_s2, %s3575_s8  }
  0x56   :  { %3557 = dma.done.wait [#allocation3], 32  }
  0x57   :  { %3558 = vsyncadd [#allocation3], 4294967264 }
  0x58   :  { %3559 = dma.done.wait [#allocation6], 1152  }
  0x59   :  { %3560 = vsyncadd [#allocation6], 4294966144 }
  0x5a   :  { %3561 = dma.done.wait [#allocation9], 36864  }
  0x5b   :  { %3562 = vsyncadd [#allocation9], 4294930432  ;;  %v3576_v0 = vmov 0   ;;  %v94_v1 = vld [vmem:[#allocation5] sm:$0xff]  ;;  %v92_v3 = vld [vmem:[#allocation2] sm:$0x3] }
  0x5c   :  { %220 = vmatprep.mubr.bf16.mxu0 %v3576_v0  ;;  %261 = vmatprep.mubr.bf16.mxu1 %v3576_v0  ;;  %v98_v2 = vld [vmem:[#allocation5 + $0x20] sm:$0xff]  ;;  %v95_v6 = vld [vmem:[#allocation5 + $0x8] sm:$0xff]  ;;  %v96_v8 = vld [vmem:[#allocation5 + $0x10] sm:$0xff]  ;;  %v93_v14 = vpack.c.bf16 %v92_v3, %v92_v3  ;;  %vm184_vm0 = vcmask 130048   ;;  %s3577_s17 = smov [#allocation11]  }
  0x5d   :  { %v2624_v4 = vcombine.high %v94_v1, %v98_v2  ;;  %v2623_v5 = vcombine.low %v94_v1, %v98_v2  ;;  %v99_v7 = vld [vmem:[#allocation5 + $0x28] sm:$0xff]  ;;  %v100_v11 = vld [vmem:[#allocation5 + $0x30] sm:$0xff]  ;;  %v97_v12 = vld [vmem:[#allocation5 + $0x18] sm:$0xff]  ;;  %s2612_s18 = sshll.u32 %s3577_s17, 4  ;;  %s2613_s18 = int_to_ptr.vmem [resolvable:$true] %s2612_s18 }
  0x5e   :  { %v2626_v9 = vcombine.high %v95_v6, %v99_v7  ;;  %v2625_v10 = vcombine.low %v95_v6, %v99_v7  ;;  %v101_v13 = vld [vmem:[#allocation5 + $0x38] sm:$0xff]  ;;  %v2628_v15 = vcombine.high %v96_v8, %v100_v11  ;;  %v2627_v17 = vcombine.low %v96_v8, %v100_v11  ;;  %v3014_v20 = vld [vmem:[#allocation8 + $0xc] ss:$16 sps:$4 sm:$0xff]   ;;  %v3012_v22 = vld [vmem:[#allocation8 + $0x8] ss:$16 sps:$4 sm:$0xff]   ;;  %s3535_s19 = scalar_lea.vmem %s2613_s18, 32  ;;  %p3540_p13 = scmp.lt.s32.totalorder %s2613_s18, %s2613_s18 }
  0x5f   :  { %188 = vmatprep.subr.bf16.mxu0 %v2624_v4  ;;  %v2630_v16 = vcombine.high %v97_v12, %v101_v13  ;;  %v2629_v18 = vcombine.low %v97_v12, %v101_v13  ;;  %v3011_v19 = vld [vmem:[#allocation8 + $0x4] ss:$16 sps:$4 sm:$0xff]   ;;  %v3009_v21 = vld [vmem:[#allocation8] ss:$16 sps:$4 sm:$0xff]   ;;  %v3020_v24 = vld [vmem:[#allocation8 + $0x2c] ss:$16 sps:$4 sm:$0xff]   ;;  %p3536_p12 = scmp.ne.s32.totalorder %s2613_s18, %s3535_s19  ;;  %p3541_p0 = scmp.lt.s32.totalorder %s3535_s19, %s3535_s19 }
  0x60   :  { %189 = vmatpush1.bf16.msra.mxu0 %v2623_v5  ;;  %229 = vmatprep.subr.bf16.mxu1 %v2626_v9  ;;  %v3017_v23 = vld [vmem:[#allocation8 + $0x24] ss:$16 sps:$4 sm:$0xff]   ;;  %v3015_v25 = vld [vmem:[#allocation8 + $0x20] ss:$16 sps:$4 sm:$0xff]   ;;  %v3018_v26 = vld [vmem:[#allocation8 + $0x28] ss:$16 sps:$4 sm:$0xff]  }
  0x61   :  { %230 = vmatpush1.bf16.msra.mxu1 %v2625_v10  ;;  %270 = vmatprep.subr.bf16.mxu0 %v2628_v15  ;;  %v3023_v27 = vld [vmem:[#allocation8 + $0x44] ss:$16 sps:$4 sm:$0xff]   ;;  %v3026_v28 = vld [vmem:[#allocation8 + $0x4c] ss:$16 sps:$4 sm:$0xff]   ;;  %v3021_v29 = vld [vmem:[#allocation8 + $0x40] ss:$16 sps:$4 sm:$0xff]   ;;  %p3542_p1 = por %p3541_p0, %p3540_p13 }
  0x62   :  { %311 = vmatprep.subr.bf16.mxu1 %v2630_v16  ;;  %v3024_v30 = vld [vmem:[#allocation8 + $0x48] ss:$16 sps:$4 sm:$0xff]   ;;  %v3029_v31 = vld [vmem:[#allocation8 + $0x64] ss:$16 sps:$4 sm:$0xff]   ;;  %v3032_v32 = vld [vmem:[#allocation8 + $0x6c] ss:$16 sps:$4 sm:$0xff]  }
  0x63   :  { %2631 = vmatmul.mubr.msk.bf16.vlgmr.msra.gmra.mrb[0].mxu0 %vm184_vm0, %v93_v14  ;;  %v3027_v33 = vld [vmem:[#allocation8 + $0x60] ss:$16 sps:$4 sm:$0xff]   ;;  %v3030_v34 = vld [vmem:[#allocation8 + $0x68] ss:$16 sps:$4 sm:$0xff]   ;;  %v3035_v35 = vld [vmem:[#allocation8 + $0x84] ss:$16 sps:$4 sm:$0xff]   ;;  %p3543_p2 = pnand %p3542_p1, %p3536_p12 }
  0x64   :  { %2632 = vmatmul.mubr.msk.bf16.vlgmr.msra.gmra.mrb[0].mxu1 %vm184_vm0, %v93_v14  ;;  %271 = vmatpush1.bf16.msra.mxu0 %v2627_v17  ;;  %v3038_v36 = vld [vmem:[#allocation8 + $0x8c] ss:$16 sps:$4 sm:$0xff]   ;;  %v3033_v37 = vld [vmem:[#allocation8 + $0x80] ss:$16 sps:$4 sm:$0xff]   ;;  %v3036_v38 = vld [vmem:[#allocation8 + $0x88] ss:$16 sps:$4 sm:$0xff]  }
  0x65   :  { %302 = vmatprep.mubr.bf16.mxu0 %v3576_v0  ;;  %312 = vmatpush1.bf16.msra.mxu1 %v2629_v18  ;;  %v3041_v39 = vld [vmem:[#allocation8 + $0xa4] ss:$16 sps:$4 sm:$0xff]   ;;  %v3044_v40 = vld [vmem:[#allocation8 + $0xac] ss:$16 sps:$4 sm:$0xff]   ;;  %v3039_v41 = vld [vmem:[#allocation8 + $0xa0] ss:$16 sps:$4 sm:$0xff]  }
  0x66   :  { %343 = vmatprep.mubr.bf16.mxu1 %v3576_v0  ;;  %1926 = vmatprep.subr.bf16.mxu0 %v3011_v19  ;;  %v3042_v42 = vld [vmem:[#allocation8 + $0xa8] ss:$16 sps:$4 sm:$0xff]   ;;  %v3047_v43 = vld [vmem:[#allocation8 + $0xc4] ss:$16 sps:$4 sm:$0xff]   ;;  %v3050_v44 = vld [vmem:[#allocation8 + $0xcc] ss:$16 sps:$4 sm:$0xff]  }
  0x67   :  { %2090 = vmatprep.subr.bf16.mxu1 %v3014_v20  ;;  %v3045_v45 = vld [vmem:[#allocation8 + $0xc0] ss:$16 sps:$4 sm:$0xff]   ;;  %v3048_v46 = vld [vmem:[#allocation8 + $0xc8] ss:$16 sps:$4 sm:$0xff]   ;;  %v3053_v47 = vld [vmem:[#allocation8 + $0xe4] ss:$16 sps:$4 sm:$0xff]  }
  0x68   :  { %v3051_v48 = vld [vmem:[#allocation8 + $0xe0] ss:$16 sps:$4 sm:$0xff]   ;;  %v3056_v49 = vld [vmem:[#allocation8 + $0xec] ss:$16 sps:$4 sm:$0xff]   ;;  %v3054_v50 = vld [vmem:[#allocation8 + $0xe8] ss:$16 sps:$4 sm:$0xff]  }
  0x69   :  { %v3059_v51 = vld [vmem:[#allocation8 + $0x104] ss:$16 sps:$4 sm:$0xff]   ;;  %v3062_v52 = vld [vmem:[#allocation8 + $0x10c] ss:$16 sps:$4 sm:$0xff]   ;;  %v3057_v53 = vld [vmem:[#allocation8 + $0x100] ss:$16 sps:$4 sm:$0xff]  }
  0x6a   :  { %v3060_v54 = vld [vmem:[#allocation8 + $0x108] ss:$16 sps:$4 sm:$0xff]   ;;  %v3065_v55 = vld [vmem:[#allocation8 + $0x124] ss:$16 sps:$4 sm:$0xff]   ;;  %v3068_v56 = vld [vmem:[#allocation8 + $0x12c] ss:$16 sps:$4 sm:$0xff]  }
  0x6b   :  { %2633 = vmatmul.mubr.msk.bf16.vlgmr.msra.gmra.mrb[4].mxu0 %vm184_vm0, %v93_v14  ;;  %v3063_v57 = vld [vmem:[#allocation8 + $0x120] ss:$16 sps:$4 sm:$0xff]   ;;  %v3066_v58 = vld [vmem:[#allocation8 + $0x128] ss:$16 sps:$4 sm:$0xff]   ;;  %v3071_v59 = vld [vmem:[#allocation8 + $0x144] ss:$16 sps:$4 sm:$0xff]  }
  0x6c   :  { %2634 = vmatmul.mubr.msk.bf16.vlgmr.msra.gmra.mrb[4].mxu1 %vm184_vm0, %v93_v14  ;;  %1927 = vmatpush1.bf16.msra.mxu0 %v3009_v21  ;;  %v3074_v60 = vld [vmem:[#allocation8 + $0x14c] ss:$16 sps:$4 sm:$0xff]   ;;  %v3069_v61 = vld [vmem:[#allocation8 + $0x140] ss:$16 sps:$4 sm:$0xff]   ;;  %v3072_v62 = vld [vmem:[#allocation8 + $0x148] ss:$16 sps:$4 sm:$0xff]   ;;  %v104_v21 = vlaneseq }
  0x6d   :  { %2091 = vmatpush1.bf16.msra.mxu1 %v3012_v22  ;;  %1928 = vmatprep.subr.bf16.mxu0 %v3017_v23  ;;  %v3077_v63 = vld [vmem:[#allocation8 + $0x164] ss:$16 sps:$4 sm:$0xff]   ;;  %v3080_v0 = vld [vmem:[#allocation8 + $0x16c] ss:$16 sps:$4 sm:$0xff]   ;;  %v3075_v1 = vld [vmem:[#allocation8 + $0x160] ss:$16 sps:$4 sm:$0xff]  }
  0x6e   :  { %2092 = vmatprep.subr.bf16.mxu1 %v3020_v24  ;;  %v3078_v2 = vld [vmem:[#allocation8 + $0x168] ss:$16 sps:$4 sm:$0xff]   ;;  %v3083_v3 = vld [vmem:[#allocation8 + $0x184] ss:$16 sps:$4 sm:$0xff]   ;;  %v3086_v4 = vld [vmem:[#allocation8 + $0x18c] ss:$16 sps:$4 sm:$0xff]  }
  0x6f   :  { %v3081_v5 = vld [vmem:[#allocation8 + $0x180] ss:$16 sps:$4 sm:$0xff]   ;;  %v3084_v6 = vld [vmem:[#allocation8 + $0x188] ss:$16 sps:$4 sm:$0xff]   ;;  %v3089_v7 = vld [vmem:[#allocation8 + $0x1a4] ss:$16 sps:$4 sm:$0xff]  }
  0x70   :  { %1929 = vmatpush1.bf16.msra.mxu0 %v3015_v25  ;;  %v3092_v8 = vld [vmem:[#allocation8 + $0x1ac] ss:$16 sps:$4 sm:$0xff]   ;;  %v3087_v9 = vld [vmem:[#allocation8 + $0x1a0] ss:$16 sps:$4 sm:$0xff]   ;;  %v3090_v10 = vld [vmem:[#allocation8 + $0x1a8] ss:$16 sps:$4 sm:$0xff]  }
  0x71   :  { %2093 = vmatpush1.bf16.msra.mxu1 %v3018_v26  ;;  %1930 = vmatprep.subr.bf16.mxu0 %v3023_v27  ;;  %v3095_v11 = vld [vmem:[#allocation8 + $0x1c4] ss:$16 sps:$4 sm:$0xff]   ;;  %v3098_v12 = vld [vmem:[#allocation8 + $0x1cc] ss:$16 sps:$4 sm:$0xff]   ;;  %v3093_v13 = vld [vmem:[#allocation8 + $0x1c0] ss:$16 sps:$4 sm:$0xff]  }
  0x72   :  { %2094 = vmatprep.subr.bf16.mxu1 %v3026_v28  ;;  %v3096_v14 = vld [vmem:[#allocation8 + $0x1c8] ss:$16 sps:$4 sm:$0xff]   ;;  %v3101_v15 = vld [vmem:[#allocation8 + $0x1e4] ss:$16 sps:$4 sm:$0xff]   ;;  %v3104_v16 = vld [vmem:[#allocation8 + $0x1ec] ss:$16 sps:$4 sm:$0xff]  }
  0x73   :  { %v3099_v17 = vld [vmem:[#allocation8 + $0x1e0] ss:$16 sps:$4 sm:$0xff]   ;;  %v3102_v18 = vld [vmem:[#allocation8 + $0x1e8] ss:$16 sps:$4 sm:$0xff]   ;;  %v3107_v19 = vld [vmem:[#allocation8 + $0x204] ss:$16 sps:$4 sm:$0xff]  }
  0x74   :  { %1931 = vmatpush1.bf16.msra.mxu0 %v3021_v29  ;;  %v3110_v20 = vld [vmem:[#allocation8 + $0x20c] ss:$16 sps:$4 sm:$0xff]   ;;  %v3682_v22 = vshrl.u32 %v104_v21, 7  ;;  %v3155_v21 = vld [vmem:[#allocation8 + $0x304] ss:$16 sps:$4 sm:$0xff]  }
  0x75   :  { %2095 = vmatpush1.bf16.msra.mxu1 %v3024_v30  ;;  %1932 = vmatprep.subr.bf16.mxu0 %v3029_v31  ;;  %v3685_v24 = vld [vmem:[#allocation7] sm:$0xff] }
  0x76   :  { %2096 = vmatprep.subr.bf16.mxu1 %v3032_v32  ;;  %v106_v23 = vsub.s32 0, %v3682_v22  ;;  %v110_v25 = vsub.s32 1, %v3682_v22  ;;  %v118_v26 = vsub.s32 3, %v3682_v22 }
  0x78   :  { %1933 = vmatpush1.bf16.msra.mxu0 %v3027_v33  ;;  %v107_v27 = vrot.slane %v3685_v24, %v106_v23  ;;  %v111_v28 = vrot.slane %v3685_v24, %v110_v25  ;;  %v119_v29 = vrot.slane %v3685_v24, %v118_v26 }
  0x79   :  { %2097 = vmatpush1.bf16.msra.mxu1 %v3030_v34  ;;  %1934 = vmatprep.subr.bf16.mxu0 %v3035_v35 }
  0x7a   :  { %2098 = vmatprep.subr.bf16.mxu1 %v3038_v36 }
  0x7c   :  { %1935 = vmatpush1.bf16.msra.mxu0 %v3033_v37 }
  0x7d   :  { %2099 = vmatpush1.bf16.msra.mxu1 %v3036_v38  ;;  %1936 = vmatprep.subr.bf16.mxu0 %v3041_v39 }
  0x7e   :  { %2100 = vmatprep.subr.bf16.mxu1 %v3044_v40 }
  0x80   :  { %1937 = vmatpush1.bf16.msra.mxu0 %v3039_v41 }
  0x81   :  { %2101 = vmatpush1.bf16.msra.mxu1 %v3042_v42  ;;  %1938 = vmatprep.subr.bf16.mxu0 %v3047_v43 }
  0x82   :  { %2102 = vmatprep.subr.bf16.mxu1 %v3050_v44 }
  0x84   :  { %1939 = vmatpush1.bf16.msra.mxu0 %v3045_v45  ;;  %v3105_v45 = vld [vmem:[#allocation8 + $0x200] ss:$16 sps:$4 sm:$0xff]  }
  0x85   :  { %2103 = vmatpush1.bf16.msra.mxu1 %v3048_v46  ;;  %1940 = vmatprep.subr.bf16.mxu0 %v3053_v47  ;;  %v3108_v46 = vld [vmem:[#allocation8 + $0x208] ss:$16 sps:$4 sm:$0xff]  }
  0x86   :  { %2104 = vmatprep.subr.bf16.mxu1 %v3056_v49  ;;  %v3116_v49 = vld [vmem:[#allocation8 + $0x22c] ss:$16 sps:$4 sm:$0xff]  }
  0x88   :  { %1941 = vmatpush1.bf16.msra.mxu0 %v3051_v48  ;;  %v3113_v48 = vld [vmem:[#allocation8 + $0x224] ss:$16 sps:$4 sm:$0xff]  }
  0x89   :  { %2105 = vmatpush1.bf16.msra.mxu1 %v3054_v50  ;;  %1942 = vmatprep.subr.bf16.mxu0 %v3059_v51 }
  0x8a   :  { %2106 = vmatprep.subr.bf16.mxu1 %v3062_v52 }
  0x8c   :  { %1943 = vmatpush1.bf16.msra.mxu0 %v3057_v53  ;;  %v3111_v53 = vld [vmem:[#allocation8 + $0x220] ss:$16 sps:$4 sm:$0xff]  }
  0x8d   :  { %2107 = vmatpush1.bf16.msra.mxu1 %v3060_v54  ;;  %1944 = vmatprep.subr.bf16.mxu0 %v3065_v55  ;;  %v3114_v54 = vld [vmem:[#allocation8 + $0x228] ss:$16 sps:$4 sm:$0xff]  }
  0x8e   :  { %2108 = vmatprep.subr.bf16.mxu1 %v3068_v56  ;;  %v3119_v56 = vld [vmem:[#allocation8 + $0x244] ss:$16 sps:$4 sm:$0xff]  }
  0x90   :  { %1945 = vmatpush1.bf16.msra.mxu0 %v3063_v57  ;;  %v3122_v57 = vld [vmem:[#allocation8 + $0x24c] ss:$16 sps:$4 sm:$0xff]  }
  0x91   :  { %2109 = vmatpush1.bf16.msra.mxu1 %v3066_v58  ;;  %1946 = vmatprep.subr.bf16.mxu0 %v3071_v59  ;;  %v3117_v59 = vld [vmem:[#allocation8 + $0x240] ss:$16 sps:$4 sm:$0xff]  }
  0x92   :  { %2110 = vmatprep.subr.bf16.mxu1 %v3074_v60  ;;  %v3120_v60 = vld [vmem:[#allocation8 + $0x248] ss:$16 sps:$4 sm:$0xff]  }
  0x94   :  { %1947 = vmatpush1.bf16.msra.mxu0 %v3069_v61  ;;  %v3125_v61 = vld [vmem:[#allocation8 + $0x264] ss:$16 sps:$4 sm:$0xff]  }
  0x95   :  { %2111 = vmatpush1.bf16.msra.mxu1 %v3072_v62  ;;  %1948 = vmatprep.subr.bf16.mxu0 %v3077_v63  ;;  %v3128_v62 = vld [vmem:[#allocation8 + $0x26c] ss:$16 sps:$4 sm:$0xff]   ;;  %v3123_v63 = vld [vmem:[#allocation8 + $0x260] ss:$16 sps:$4 sm:$0xff]  }
  0x96   :  { %2112 = vmatprep.subr.bf16.mxu1 %v3080_v0  ;;  %v3126_v0 = vld [vmem:[#allocation8 + $0x268] ss:$16 sps:$4 sm:$0xff]  }
  0x98   :  { %1949 = vmatpush1.bf16.msra.mxu0 %v3075_v1  ;;  %v3131_v1 = vld [vmem:[#allocation8 + $0x284] ss:$16 sps:$4 sm:$0xff]  }
  0x99   :  { %2113 = vmatpush1.bf16.msra.mxu1 %v3078_v2  ;;  %1950 = vmatprep.subr.bf16.mxu0 %v3083_v3  ;;  %v3134_v2 = vld [vmem:[#allocation8 + $0x28c] ss:$16 sps:$4 sm:$0xff]   ;;  %v3129_v3 = vld [vmem:[#allocation8 + $0x280] ss:$16 sps:$4 sm:$0xff]  }
  0x9a   :  { %2114 = vmatprep.subr.bf16.mxu1 %v3086_v4  ;;  %v3132_v4 = vld [vmem:[#allocation8 + $0x288] ss:$16 sps:$4 sm:$0xff]  }
  0x9c   :  { %1951 = vmatpush1.bf16.msra.mxu0 %v3081_v5  ;;  %v3137_v5 = vld [vmem:[#allocation8 + $0x2a4] ss:$16 sps:$4 sm:$0xff]  }
  0x9d   :  { %2115 = vmatpush1.bf16.msra.mxu1 %v3084_v6  ;;  %1952 = vmatprep.subr.bf16.mxu0 %v3089_v7  ;;  %v3140_v6 = vld [vmem:[#allocation8 + $0x2ac] ss:$16 sps:$4 sm:$0xff]   ;;  %v3135_v7 = vld [vmem:[#allocation8 + $0x2a0] ss:$16 sps:$4 sm:$0xff]  }
  0x9e   :  { %2116 = vmatprep.subr.bf16.mxu1 %v3092_v8  ;;  %v3138_v8 = vld [vmem:[#allocation8 + $0x2a8] ss:$16 sps:$4 sm:$0xff]  }
  0xa0   :  { %1953 = vmatpush1.bf16.msra.mxu0 %v3087_v9 }
  0xa1   :  { %2117 = vmatpush1.bf16.msra.mxu1 %v3090_v10  ;;  %1954 = vmatprep.subr.bf16.mxu0 %v3095_v11  ;;  %v3143_v10 = vld [vmem:[#allocation8 + $0x2c4] ss:$16 sps:$4 sm:$0xff]   ;;  %v3146_v11 = vld [vmem:[#allocation8 + $0x2cc] ss:$16 sps:$4 sm:$0xff]  }
  0xa2   :  { %2118 = vmatprep.subr.bf16.mxu1 %v3098_v12 }
  0xa4   :  { %1955 = vmatpush1.bf16.msra.mxu0 %v3093_v13 }
  0xa5   :  { %2119 = vmatpush1.bf16.msra.mxu1 %v3096_v14  ;;  %1956 = vmatprep.subr.bf16.mxu0 %v3101_v15  ;;  %v3141_v15 = vld [vmem:[#allocation8 + $0x2c0] ss:$16 sps:$4 sm:$0xff]  }
  0xa6   :  { %2120 = vmatprep.subr.bf16.mxu1 %v3104_v16  ;;  %v3144_v16 = vld [vmem:[#allocation8 + $0x2c8] ss:$16 sps:$4 sm:$0xff]  }
  0xa8   :  { %1957 = vmatpush1.bf16.msra.mxu0 %v3099_v17  ;;  %v3149_v17 = vld [vmem:[#allocation8 + $0x2e4] ss:$16 sps:$4 sm:$0xff]  }
  0xa9   :  { %2121 = vmatpush1.bf16.msra.mxu1 %v3102_v18  ;;  %1967 = vmatprep.subr.bf16.mxu0 %v3107_v19  ;;  %v3152_v18 = vld [vmem:[#allocation8 + $0x2ec] ss:$16 sps:$4 sm:$0xff]   ;;  %v3147_v19 = vld [vmem:[#allocation8 + $0x2e0] ss:$16 sps:$4 sm:$0xff]  }
  0xaa   :  { %2131 = vmatprep.subr.bf16.mxu1 %v3110_v20  ;;  %v3150_v20 = vld [vmem:[#allocation8 + $0x2e8] ss:$16 sps:$4 sm:$0xff]  }
 0x136   :  { %v222_v30 = vpop.f32.mrb[0].mxu0 }
 0x137   :  { %v223_v31 = vadd.f32 %v222_v30, %v107_v27  ;;  %v224_v32 = vpop.f32.mrb[1].mxu0  ;;  %v3698_v33 = vpop.f32.mrb[0].mxu1  ;;  %v3158_v27 = vld [vmem:[#allocation8 + $0x30c] ss:$16 sps:$4 sm:$0xff]   ;;  %v3161_v30 = vld [vmem:[#allocation8 + $0x324] ss:$16 sps:$4 sm:$0xff]  }
 0x138   :  { %v225_v34 = vadd.f32 %v224_v32, %v111_v28  ;;  %v226_v35 = vpop.f32.mrb[2].mxu0  ;;  %v265_v36 = vpop.f32.mrb[1].mxu1  ;;  %v3153_v28 = vld [vmem:[#allocation8 + $0x300] ss:$16 sps:$4 sm:$0xff]  }
 0x139   :  { %v352_v37 = vmax.f32 %v223_v31, 0.0  ;;  %v227_v38 = vpop.f32.mrb[3].mxu0  ;;  %v266_v39 = vadd.f32 %v265_v36, %v119_v29  ;;  %v267_v40 = vpop.f32.mrb[2].mxu1  ;;  %v3156_v29 = vld [vmem:[#allocation8 + $0x308] ss:$16 sps:$4 sm:$0xff]  }
 0x13a   :  { %v353_v41 = vmax.f32 %v225_v34, 0.0  ;;  %v268_v42 = vpop.f32.mrb[3].mxu1  ;;  %v3164_v31 = vld [vmem:[#allocation8 + $0x32c] ss:$16 sps:$4 sm:$0xff]   ;;  %v3159_v32 = vld [vmem:[#allocation8 + $0x320] ss:$16 sps:$4 sm:$0xff]  }
 0x13b   :  { %v355_v43 = vmax.f32 %v266_v39, 0.0  ;;  %v360_v47 = vpack.c.bf16 %v352_v37, %v352_v37  ;;  %v3162_v34 = vld [vmem:[#allocation8 + $0x328] ss:$16 sps:$4 sm:$0xff]   ;;  %v3167_v35 = vld [vmem:[#allocation8 + $0x344] ss:$16 sps:$4 sm:$0xff]  }
 0x13c   :  { %v361_v44 = vpack.c.bf16 %v353_v41, %v353_v41  ;;  %v3170_v36 = vld [vmem:[#allocation8 + $0x34c] ss:$16 sps:$4 sm:$0xff]   ;;  %v3165_v37 = vld [vmem:[#allocation8 + $0x340] ss:$16 sps:$4 sm:$0xff]   ;;  %v3168_v38 = vld [vmem:[#allocation8 + $0x348] ss:$16 sps:$4 sm:$0xff]  }
 0x13d   :  { %v363_v50 = vpack.c.bf16 %v355_v43, %v355_v43  ;;  %v3173_v39 = vld [vmem:[#allocation8 + $0x364] ss:$16 sps:$4 sm:$0xff]   ;;  %v3176_v40 = vld [vmem:[#allocation8 + $0x36c] ss:$16 sps:$4 sm:$0xff]   ;;  %v3171_v41 = vld [vmem:[#allocation8 + $0x360] ss:$16 sps:$4 sm:$0xff]  }
 0x13e   :  { %1958 = vmatprep.mubr.bf16.mxu0 %v361_v44  ;;  %2122 = vmatprep.mubr.bf16.mxu1 %v361_v44  ;;  %v3700_v51 = vpop.f32.mrb[4].mxu0  ;;  %v3174_v42 = vld [vmem:[#allocation8 + $0x368] ss:$16 sps:$4 sm:$0xff]   ;;  %v3179_v43 = vld [vmem:[#allocation8 + $0x384] ss:$16 sps:$4 sm:$0xff]  }
 0x13f   :  { %1959 = vmatmul.mubr.bf16.vlgmr.msra.gmra.mrb[8].mxu0 %v360_v47  ;;  %2123 = vmatmul.mubr.bf16.vlgmr.msra.gmra.mrb[8].mxu1 %v360_v47  ;;  %v3702_v52 = vpop.f32.mrb[5].mxu0  ;;  %v3704_v9 = vpop.f32.mrb[4].mxu1  ;;  %v3182_v44 = vld [vmem:[#allocation8 + $0x38c] ss:$16 sps:$4 sm:$0xff]   ;;  %v3180_v47 = vld [vmem:[#allocation8 + $0x388] ss:$16 sps:$4 sm:$0xff]  }
 0x140   :  { %1968 = vmatpush1.bf16.msra.mxu0 %v3105_v45  ;;  %2132 = vmatpush1.bf16.msra.mxu1 %v3108_v46  ;;  %v308_v55 = vpop.f32.mrb[6].mxu0  ;;  %v3706_v12 = vpop.f32.mrb[5].mxu1  ;;  %v114_v45 = vsub.s32 2, %v3682_v22  ;;  %v3177_v46 = vld [vmem:[#allocation8 + $0x380] ss:$16 sps:$4 sm:$0xff]  }
 0x141   :  { %1969 = vmatprep.subr.bf16.mxu0 %v3113_v48  ;;  %2133 = vmatprep.subr.bf16.mxu1 %v3116_v49  ;;  %v309_v58 = vpop.f32.mrb[7].mxu0  ;;  %v349_v13 = vpop.f32.mrb[6].mxu1  ;;  %v3185_v48 = vld [vmem:[#allocation8 + $0x3a4] ss:$16 sps:$4 sm:$0xff]   ;;  %v3188_v49 = vld [vmem:[#allocation8 + $0x3ac] ss:$16 sps:$4 sm:$0xff]  }
 0x142   :  { %1999 = vmatprep.mubr.bf16.mxu0 %v363_v50  ;;  %2163 = vmatprep.mubr.bf16.mxu1 %v363_v50  ;;  %v350_v14 = vpop.f32.mrb[7].mxu1  ;;  %v126_v50 = vsub.s32 5, %v3682_v22  ;;  %v3186_v55 = vld [vmem:[#allocation8 + $0x3a8] ss:$16 sps:$4 sm:$0xff]   ;;  %v3207_v13 = vld [vmem:[#allocation8 + $0x420] ss:$16 sps:$4 sm:$0xff]  }
 0x143   :  { %v3210_v14 = vld [vmem:[#allocation8 + $0x428] ss:$16 sps:$4 sm:$0xff]  }
 0x144   :  { %1970 = vmatpush1.bf16.msra.mxu0 %v3111_v53  ;;  %2134 = vmatpush1.bf16.msra.mxu1 %v3114_v54  ;;  %v115_v53 = vrot.slane %v3685_v24, %v114_v45  ;;  %v3183_v54 = vld [vmem:[#allocation8 + $0x3a0] ss:$16 sps:$4 sm:$0xff]   ;;  %v127_v58 = vrot.slane %v3685_v24, %v126_v50  ;;  %v3257_v50 = vld [vmem:[#allocation8 + $0x524] ss:$16 sps:$4 sm:$0xff]  }
 0x145   :  { %1971 = vmatprep.subr.bf16.mxu0 %v3119_v56  ;;  %2135 = vmatprep.subr.bf16.mxu1 %v3122_v57  ;;  %v3191_v56 = vld [vmem:[#allocation8 + $0x3c4] ss:$16 sps:$4 sm:$0xff]   ;;  %v3194_v57 = vld [vmem:[#allocation8 + $0x3cc] ss:$16 sps:$4 sm:$0xff]  }
 0x148   :  { %1972 = vmatpush1.bf16.msra.mxu0 %v3117_v59  ;;  %2136 = vmatpush1.bf16.msra.mxu1 %v3120_v60  ;;  %v264_v59 = vadd.f32 %v3698_v33, %v115_v53  ;;  %v3189_v60 = vld [vmem:[#allocation8 + $0x3c0] ss:$16 sps:$4 sm:$0xff]   ;;  %v3260_v53 = vld [vmem:[#allocation8 + $0x52c] ss:$16 sps:$4 sm:$0xff]  }
 0x149   :  { %1973 = vmatprep.subr.bf16.mxu0 %v3125_v61  ;;  %2137 = vmatprep.subr.bf16.mxu1 %v3128_v62  ;;  %v3192_v61 = vld [vmem:[#allocation8 + $0x3c8] ss:$16 sps:$4 sm:$0xff]   ;;  %v3197_v62 = vld [vmem:[#allocation8 + $0x3e4] ss:$16 sps:$4 sm:$0xff]  }
 0x14c   :  { %1974 = vmatpush1.bf16.msra.mxu0 %v3123_v63  ;;  %2138 = vmatpush1.bf16.msra.mxu1 %v3126_v0  ;;  %v3200_v63 = vld [vmem:[#allocation8 + $0x3ec] ss:$16 sps:$4 sm:$0xff]   ;;  %v307_v0 = vadd.f32 %v3702_v52, %v127_v58  ;;  %v3261_v58 = vld [vmem:[#allocation8 + $0x540] ss:$16 sps:$4 sm:$0xff]  }
 0x14d   :  { %1975 = vmatprep.subr.bf16.mxu0 %v3131_v1  ;;  %2139 = vmatprep.subr.bf16.mxu1 %v3134_v2  ;;  %v354_v1 = vmax.f32 %v264_v59, 0.0  ;;  %v3195_v2 = vld [vmem:[#allocation8 + $0x3e0] ss:$16 sps:$4 sm:$0xff]   ;;  %v3264_v59 = vld [vmem:[#allocation8 + $0x548] ss:$16 sps:$4 sm:$0xff]  }
 0x14e   :  { %v357_v33 = vmax.f32 %v307_v0, 0.0  ;;  %v3275_v0 = vld [vmem:[#allocation8 + $0x584] ss:$16 sps:$4 sm:$0xff]  }
 0x150   :  { %1976 = vmatpush1.bf16.msra.mxu0 %v3129_v3  ;;  %2140 = vmatpush1.bf16.msra.mxu1 %v3132_v4  ;;  %v3198_v3 = vld [vmem:[#allocation8 + $0x3e8] ss:$16 sps:$4 sm:$0xff]   ;;  %v3203_v4 = vld [vmem:[#allocation8 + $0x404] ss:$16 sps:$4 sm:$0xff]   ;;  %v365_v52 = vpack.c.bf16 %v357_v33, %v357_v33  ;;  %v3284_v33 = vld [vmem:[#allocation8 + $0x5ac] ss:$16 sps:$4 sm:$0xff]  }
 0x151   :  { %1977 = vmatprep.subr.bf16.mxu0 %v3137_v5  ;;  %2141 = vmatprep.subr.bf16.mxu1 %v3140_v6  ;;  %v3206_v5 = vld [vmem:[#allocation8 + $0x40c] ss:$16 sps:$4 sm:$0xff]   ;;  %v362_v6 = vpack.c.bf16 %v354_v1, %v354_v1 }
 0x152   :  { %v3278_v1 = vld [vmem:[#allocation8 + $0x58c] ss:$16 sps:$4 sm:$0xff]  }
 0x154   :  { %1978 = vmatpush1.bf16.msra.mxu0 %v3135_v7  ;;  %2142 = vmatpush1.bf16.msra.mxu1 %v3138_v8  ;;  %v3201_v7 = vld [vmem:[#allocation8 + $0x400] ss:$16 sps:$4 sm:$0xff]   ;;  %v3204_v8 = vld [vmem:[#allocation8 + $0x408] ss:$16 sps:$4 sm:$0xff]  }
 0x155   :  { %1979 = vmatprep.subr.bf16.mxu0 %v3143_v10  ;;  %2143 = vmatprep.subr.bf16.mxu1 %v3146_v11  ;;  %v3209_v10 = vld [vmem:[#allocation8 + $0x424] ss:$16 sps:$4 sm:$0xff]   ;;  %v3212_v11 = vld [vmem:[#allocation8 + $0x42c] ss:$16 sps:$4 sm:$0xff]  }
 0x158   :  { %1980 = vmatpush1.bf16.msra.mxu0 %v3141_v15  ;;  %2144 = vmatpush1.bf16.msra.mxu1 %v3144_v16  ;;  %v3215_v15 = vld [vmem:[#allocation8 + $0x444] ss:$16 sps:$4 sm:$0xff]   ;;  %v3218_v16 = vld [vmem:[#allocation8 + $0x44c] ss:$16 sps:$4 sm:$0xff]  }
 0x159   :  { %1981 = vmatprep.subr.bf16.mxu0 %v3149_v17  ;;  %2145 = vmatprep.subr.bf16.mxu1 %v3152_v18  ;;  %v3213_v17 = vld [vmem:[#allocation8 + $0x440] ss:$16 sps:$4 sm:$0xff]   ;;  %v3216_v18 = vld [vmem:[#allocation8 + $0x448] ss:$16 sps:$4 sm:$0xff]  }
 0x15c   :  { %1982 = vmatpush1.bf16.msra.mxu0 %v3147_v19  ;;  %2146 = vmatpush1.bf16.msra.mxu1 %v3150_v20  ;;  %v3221_v19 = vld [vmem:[#allocation8 + $0x464] ss:$16 sps:$4 sm:$0xff]   ;;  %v3224_v20 = vld [vmem:[#allocation8 + $0x46c] ss:$16 sps:$4 sm:$0xff]  }
 0x15d   :  { %1983 = vmatprep.subr.bf16.mxu0 %v3155_v21  ;;  %2147 = vmatprep.subr.bf16.mxu1 %v3158_v27  ;;  %v3219_v21 = vld [vmem:[#allocation8 + $0x460] ss:$16 sps:$4 sm:$0xff]   ;;  %v3222_v27 = vld [vmem:[#allocation8 + $0x468] ss:$16 sps:$4 sm:$0xff]  }
 0x160   :  { %1984 = vmatpush1.bf16.msra.mxu0 %v3153_v28  ;;  %2148 = vmatpush1.bf16.msra.mxu1 %v3156_v29  ;;  %v3227_v28 = vld [vmem:[#allocation8 + $0x484] ss:$16 sps:$4 sm:$0xff]   ;;  %v3230_v29 = vld [vmem:[#allocation8 + $0x48c] ss:$16 sps:$4 sm:$0xff]  }
 0x161   :  { %1985 = vmatprep.subr.bf16.mxu0 %v3161_v30  ;;  %2149 = vmatprep.subr.bf16.mxu1 %v3164_v31  ;;  %v3225_v30 = vld [vmem:[#allocation8 + $0x480] ss:$16 sps:$4 sm:$0xff]   ;;  %v3228_v31 = vld [vmem:[#allocation8 + $0x488] ss:$16 sps:$4 sm:$0xff]  }
 0x164   :  { %1986 = vmatpush1.bf16.msra.mxu0 %v3159_v32  ;;  %2150 = vmatpush1.bf16.msra.mxu1 %v3162_v34  ;;  %v3233_v32 = vld [vmem:[#allocation8 + $0x4a4] ss:$16 sps:$4 sm:$0xff]   ;;  %v3236_v34 = vld [vmem:[#allocation8 + $0x4ac] ss:$16 sps:$4 sm:$0xff]  }
 0x165   :  { %1987 = vmatprep.subr.bf16.mxu0 %v3167_v35  ;;  %2151 = vmatprep.subr.bf16.mxu1 %v3170_v36  ;;  %v3231_v35 = vld [vmem:[#allocation8 + $0x4a0] ss:$16 sps:$4 sm:$0xff]   ;;  %v3234_v36 = vld [vmem:[#allocation8 + $0x4a8] ss:$16 sps:$4 sm:$0xff]  }
 0x168   :  { %1988 = vmatpush1.bf16.msra.mxu0 %v3165_v37  ;;  %2152 = vmatpush1.bf16.msra.mxu1 %v3168_v38  ;;  %v3239_v37 = vld [vmem:[#allocation8 + $0x4c4] ss:$16 sps:$4 sm:$0xff]   ;;  %v3242_v38 = vld [vmem:[#allocation8 + $0x4cc] ss:$16 sps:$4 sm:$0xff]  }
 0x169   :  { %1989 = vmatprep.subr.bf16.mxu0 %v3173_v39  ;;  %2153 = vmatprep.subr.bf16.mxu1 %v3176_v40  ;;  %v3237_v39 = vld [vmem:[#allocation8 + $0x4c0] ss:$16 sps:$4 sm:$0xff]   ;;  %v3240_v40 = vld [vmem:[#allocation8 + $0x4c8] ss:$16 sps:$4 sm:$0xff]  }
 0x16c   :  { %1990 = vmatpush1.bf16.msra.mxu0 %v3171_v41  ;;  %2154 = vmatpush1.bf16.msra.mxu1 %v3174_v42  ;;  %v3245_v41 = vld [vmem:[#allocation8 + $0x4e4] ss:$16 sps:$4 sm:$0xff]   ;;  %v3248_v42 = vld [vmem:[#allocation8 + $0x4ec] ss:$16 sps:$4 sm:$0xff]  }
 0x16d   :  { %1991 = vmatprep.subr.bf16.mxu0 %v3179_v43  ;;  %2155 = vmatprep.subr.bf16.mxu1 %v3182_v44  ;;  %v3243_v43 = vld [vmem:[#allocation8 + $0x4e0] ss:$16 sps:$4 sm:$0xff]   ;;  %v3246_v44 = vld [vmem:[#allocation8 + $0x4e8] ss:$16 sps:$4 sm:$0xff]  }
 0x170   :  { %1992 = vmatpush1.bf16.msra.mxu0 %v3177_v46  ;;  %2156 = vmatpush1.bf16.msra.mxu1 %v3180_v47  ;;  %v3251_v46 = vld [vmem:[#allocation8 + $0x504] ss:$16 sps:$4 sm:$0xff]   ;;  %v3254_v47 = vld [vmem:[#allocation8 + $0x50c] ss:$16 sps:$4 sm:$0xff]  }
 0x171   :  { %1993 = vmatprep.subr.bf16.mxu0 %v3185_v48  ;;  %2157 = vmatprep.subr.bf16.mxu1 %v3188_v49  ;;  %v3249_v48 = vld [vmem:[#allocation8 + $0x500] ss:$16 sps:$4 sm:$0xff]   ;;  %v3252_v49 = vld [vmem:[#allocation8 + $0x508] ss:$16 sps:$4 sm:$0xff]  }
 0x174   :  { %1994 = vmatpush1.bf16.msra.mxu0 %v3183_v54  ;;  %2158 = vmatpush1.bf16.msra.mxu1 %v3186_v55  ;;  %v3255_v54 = vld [vmem:[#allocation8 + $0x520] ss:$16 sps:$4 sm:$0xff]   ;;  %v3258_v55 = vld [vmem:[#allocation8 + $0x528] ss:$16 sps:$4 sm:$0xff]  }
 0x175   :  { %1995 = vmatprep.subr.bf16.mxu0 %v3191_v56  ;;  %2159 = vmatprep.subr.bf16.mxu1 %v3194_v57  ;;  %v3263_v56 = vld [vmem:[#allocation8 + $0x544] ss:$16 sps:$4 sm:$0xff]   ;;  %v3266_v57 = vld [vmem:[#allocation8 + $0x54c] ss:$16 sps:$4 sm:$0xff]  }
 0x178   :  { %1996 = vmatpush1.bf16.msra.mxu0 %v3189_v60  ;;  %2160 = vmatpush1.bf16.msra.mxu1 %v3192_v61  ;;  %v3269_v60 = vld [vmem:[#allocation8 + $0x564] ss:$16 sps:$4 sm:$0xff]   ;;  %v3272_v61 = vld [vmem:[#allocation8 + $0x56c] ss:$16 sps:$4 sm:$0xff]  }
 0x179   :  { %1997 = vmatprep.subr.bf16.mxu0 %v3197_v62  ;;  %2161 = vmatprep.subr.bf16.mxu1 %v3200_v63  ;;  %v3267_v62 = vld [vmem:[#allocation8 + $0x560] ss:$16 sps:$4 sm:$0xff]   ;;  %v3270_v63 = vld [vmem:[#allocation8 + $0x568] ss:$16 sps:$4 sm:$0xff]  }
 0x17c   :  { %1998 = vmatpush1.bf16.msra.mxu0 %v3195_v2  ;;  %2162 = vmatpush1.bf16.msra.mxu1 %v3198_v3  ;;  %v122_v2 = vsub.s32 4, %v3682_v22  ;;  %v3273_v3 = vld [vmem:[#allocation8 + $0x580] ss:$16 sps:$4 sm:$0xff]  }
 0x17d   :  { %2008 = vmatprep.subr.bf16.mxu0 %v3203_v4  ;;  %2172 = vmatprep.subr.bf16.mxu1 %v3206_v5  ;;  %v3276_v4 = vld [vmem:[#allocation8 + $0x588] ss:$16 sps:$4 sm:$0xff]   ;;  %v3281_v5 = vld [vmem:[#allocation8 + $0x5a4] ss:$16 sps:$4 sm:$0xff]  }
 0x17f   :  { %2000 = vmatmul.mubr.bf16.vlgmr.msra.gmra.mrb[8].mxu0 %v362_v6  ;;  %2164 = vmatmul.mubr.bf16.vlgmr.msra.gmra.mrb[8].mxu1 %v362_v6  ;;  %v134_v6 = vsub.s32 7, %v3682_v22 }
 0x180   :  { %2009 = vmatpush1.bf16.msra.mxu0 %v3201_v7  ;;  %2173 = vmatpush1.bf16.msra.mxu1 %v3204_v8  ;;  %v123_v7 = vrot.slane %v3685_v24, %v122_v2  ;;  %v3279_v8 = vld [vmem:[#allocation8 + $0x5a0] ss:$16 sps:$4 sm:$0xff]   ;;  %v3350_v2 = vld [vmem:[#allocation8 + $0x70c] ss:$16 sps:$4 sm:$0xff]  }
 0x181   :  { %2010 = vmatprep.subr.bf16.mxu0 %v3209_v10  ;;  %2174 = vmatprep.subr.bf16.mxu1 %v3212_v11  ;;  %v3282_v10 = vld [vmem:[#allocation8 + $0x5a8] ss:$16 sps:$4 sm:$0xff]   ;;  %v3287_v11 = vld [vmem:[#allocation8 + $0x5c4] ss:$16 sps:$4 sm:$0xff]  }
 0x182   :  { %2040 = vmatprep.mubr.bf16.mxu0 %v365_v52  ;;  %2204 = vmatprep.mubr.bf16.mxu1 %v365_v52  ;;  %v3290_v52 = vld [vmem:[#allocation8 + $0x5cc] ss:$16 sps:$4 sm:$0xff]  }
 0x184   :  { %2011 = vmatpush1.bf16.msra.mxu0 %v3207_v13  ;;  %2175 = vmatpush1.bf16.msra.mxu1 %v3210_v14  ;;  %v135_v13 = vrot.slane %v3685_v24, %v134_v6  ;;  %v305_v14 = vadd.f32 %v3700_v51, %v123_v7  ;;  %v3351_v6 = vld [vmem:[#allocation8 + $0x720] ss:$16 sps:$4 sm:$0xff]   ;;  %v3354_v7 = vld [vmem:[#allocation8 + $0x728] ss:$16 sps:$4 sm:$0xff]  }
 0x185   :  { %2012 = vmatprep.subr.bf16.mxu0 %v3215_v15  ;;  %2176 = vmatprep.subr.bf16.mxu1 %v3218_v16  ;;  %v3285_v15 = vld [vmem:[#allocation8 + $0x5c0] ss:$16 sps:$4 sm:$0xff]   ;;  %v3288_v16 = vld [vmem:[#allocation8 + $0x5c8] ss:$16 sps:$4 sm:$0xff]  }
 0x188   :  { %2013 = vmatpush1.bf16.msra.mxu0 %v3213_v17  ;;  %2177 = vmatpush1.bf16.msra.mxu1 %v3216_v18  ;;  %v3293_v17 = vld [vmem:[#allocation8 + $0x5e4] ss:$16 sps:$4 sm:$0xff]   ;;  %v3296_v18 = vld [vmem:[#allocation8 + $0x5ec] ss:$16 sps:$4 sm:$0xff]  }
 0x189   :  { %2014 = vmatprep.subr.bf16.mxu0 %v3221_v19  ;;  %2178 = vmatprep.subr.bf16.mxu1 %v3224_v20  ;;  %v348_v19 = vadd.f32 %v3706_v12, %v135_v13  ;;  %v356_v20 = vmax.f32 %v305_v14, 0.0  ;;  %v3365_v13 = vld [vmem:[#allocation8 + $0x764] ss:$16 sps:$4 sm:$0xff]   ;;  %v3368_v14 = vld [vmem:[#allocation8 + $0x76c] ss:$16 sps:$4 sm:$0xff]  }
 0x18b   :  { %v359_v51 = vmax.f32 %v348_v19, 0.0  ;;  %v3369_v19 = vld [vmem:[#allocation8 + $0x780] ss:$16 sps:$4 sm:$0xff]  }
 0x18c   :  { %2015 = vmatpush1.bf16.msra.mxu0 %v3219_v21  ;;  %2179 = vmatpush1.bf16.msra.mxu1 %v3222_v27  ;;  %v3291_v21 = vld [vmem:[#allocation8 + $0x5e0] ss:$16 sps:$4 sm:$0xff]   ;;  %v3294_v27 = vld [vmem:[#allocation8 + $0x5e8] ss:$16 sps:$4 sm:$0xff]  }
 0x18d   :  { %2016 = vmatprep.subr.bf16.mxu0 %v3227_v28  ;;  %2180 = vmatprep.subr.bf16.mxu1 %v3230_v29  ;;  %v3299_v28 = vld [vmem:[#allocation8 + $0x604] ss:$16 sps:$4 sm:$0xff]   ;;  %v3302_v29 = vld [vmem:[#allocation8 + $0x60c] ss:$16 sps:$4 sm:$0xff]   ;;  %v367_v12 = vpack.c.bf16 %v359_v51, %v359_v51  ;;  %v3378_v51 = vld [vmem:[#allocation8 + $0x7a8] ss:$16 sps:$4 sm:$0xff]  }
 0x190   :  { %2017 = vmatpush1.bf16.msra.mxu0 %v3225_v30  ;;  %2181 = vmatpush1.bf16.msra.mxu1 %v3228_v31  ;;  %v364_v30 = vpack.c.bf16 %v356_v20, %v356_v20  ;;  %v3297_v31 = vld [vmem:[#allocation8 + $0x600] ss:$16 sps:$4 sm:$0xff]   ;;  %v3372_v20 = vld [vmem:[#allocation8 + $0x788] ss:$16 sps:$4 sm:$0xff]  }
 0x191   :  { %2018 = vmatprep.subr.bf16.mxu0 %v3233_v32  ;;  %2182 = vmatprep.subr.bf16.mxu1 %v3236_v34  ;;  %v3300_v32 = vld [vmem:[#allocation8 + $0x608] ss:$16 sps:$4 sm:$0xff]   ;;  %v3305_v34 = vld [vmem:[#allocation8 + $0x624] ss:$16 sps:$4 sm:$0xff]  }
 0x194   :  { %2019 = vmatpush1.bf16.msra.mxu0 %v3231_v35  ;;  %2183 = vmatpush1.bf16.msra.mxu1 %v3234_v36  ;;  %v3308_v35 = vld [vmem:[#allocation8 + $0x62c] ss:$16 sps:$4 sm:$0xff]   ;;  %v3303_v36 = vld [vmem:[#allocation8 + $0x620] ss:$16 sps:$4 sm:$0xff]  }
 0x195   :  { %2020 = vmatprep.subr.bf16.mxu0 %v3239_v37  ;;  %2184 = vmatprep.subr.bf16.mxu1 %v3242_v38  ;;  %v3306_v37 = vld [vmem:[#allocation8 + $0x628] ss:$16 sps:$4 sm:$0xff]   ;;  %v3311_v38 = vld [vmem:[#allocation8 + $0x644] ss:$16 sps:$4 sm:$0xff]  }
 0x198   :  { %2021 = vmatpush1.bf16.msra.mxu0 %v3237_v39  ;;  %2185 = vmatpush1.bf16.msra.mxu1 %v3240_v40  ;;  %v3314_v39 = vld [vmem:[#allocation8 + $0x64c] ss:$16 sps:$4 sm:$0xff]   ;;  %v3309_v40 = vld [vmem:[#allocation8 + $0x640] ss:$16 sps:$4 sm:$0xff]  }
 0x199   :  { %2022 = vmatprep.subr.bf16.mxu0 %v3245_v41  ;;  %2186 = vmatprep.subr.bf16.mxu1 %v3248_v42  ;;  %v3312_v41 = vld [vmem:[#allocation8 + $0x648] ss:$16 sps:$4 sm:$0xff]   ;;  %v3317_v42 = vld [vmem:[#allocation8 + $0x664] ss:$16 sps:$4 sm:$0xff]  }
 0x19c   :  { %2023 = vmatpush1.bf16.msra.mxu0 %v3243_v43  ;;  %2187 = vmatpush1.bf16.msra.mxu1 %v3246_v44  ;;  %v3320_v43 = vld [vmem:[#allocation8 + $0x66c] ss:$16 sps:$4 sm:$0xff]   ;;  %v3315_v44 = vld [vmem:[#allocation8 + $0x660] ss:$16 sps:$4 sm:$0xff]  }
 0x19d   :  { %2024 = vmatprep.subr.bf16.mxu0 %v3251_v46  ;;  %2188 = vmatprep.subr.bf16.mxu1 %v3254_v47  ;;  %v3318_v46 = vld [vmem:[#allocation8 + $0x668] ss:$16 sps:$4 sm:$0xff]   ;;  %v3323_v47 = vld [vmem:[#allocation8 + $0x684] ss:$16 sps:$4 sm:$0xff]  }
 0x1a0   :  { %2025 = vmatpush1.bf16.msra.mxu0 %v3249_v48  ;;  %2189 = vmatpush1.bf16.msra.mxu1 %v3252_v49  ;;  %v3326_v48 = vld [vmem:[#allocation8 + $0x68c] ss:$16 sps:$4 sm:$0xff]   ;;  %v3321_v49 = vld [vmem:[#allocation8 + $0x680] ss:$16 sps:$4 sm:$0xff]  }
 0x1a1   :  { %2026 = vmatprep.subr.bf16.mxu0 %v3257_v50  ;;  %2190 = vmatprep.subr.bf16.mxu1 %v3260_v53  ;;  %v3324_v50 = vld [vmem:[#allocation8 + $0x688] ss:$16 sps:$4 sm:$0xff]   ;;  %v3329_v53 = vld [vmem:[#allocation8 + $0x6a4] ss:$16 sps:$4 sm:$0xff]  }
 0x1a4   :  { %2027 = vmatpush1.bf16.msra.mxu0 %v3255_v54  ;;  %2191 = vmatpush1.bf16.msra.mxu1 %v3258_v55  ;;  %v3332_v54 = vld [vmem:[#allocation8 + $0x6ac] ss:$16 sps:$4 sm:$0xff]   ;;  %v3327_v55 = vld [vmem:[#allocation8 + $0x6a0] ss:$16 sps:$4 sm:$0xff]  }
 0x1a5   :  { %2028 = vmatprep.subr.bf16.mxu0 %v3263_v56  ;;  %2192 = vmatprep.subr.bf16.mxu1 %v3266_v57  ;;  %v3330_v56 = vld [vmem:[#allocation8 + $0x6a8] ss:$16 sps:$4 sm:$0xff]   ;;  %v3335_v57 = vld [vmem:[#allocation8 + $0x6c4] ss:$16 sps:$4 sm:$0xff]  }
 0x1a8   :  { %2029 = vmatpush1.bf16.msra.mxu0 %v3261_v58  ;;  %2193 = vmatpush1.bf16.msra.mxu1 %v3264_v59  ;;  %v3338_v58 = vld [vmem:[#allocation8 + $0x6cc] ss:$16 sps:$4 sm:$0xff]   ;;  %v3333_v59 = vld [vmem:[#allocation8 + $0x6c0] ss:$16 sps:$4 sm:$0xff]  }
 0x1a9   :  { %2030 = vmatprep.subr.bf16.mxu0 %v3269_v60  ;;  %2194 = vmatprep.subr.bf16.mxu1 %v3272_v61  ;;  %v3336_v60 = vld [vmem:[#allocation8 + $0x6c8] ss:$16 sps:$4 sm:$0xff]   ;;  %v3341_v61 = vld [vmem:[#allocation8 + $0x6e4] ss:$16 sps:$4 sm:$0xff]  }
 0x1ac   :  { %2031 = vmatpush1.bf16.msra.mxu0 %v3267_v62  ;;  %2195 = vmatpush1.bf16.msra.mxu1 %v3270_v63  ;;  %v3344_v62 = vld [vmem:[#allocation8 + $0x6ec] ss:$16 sps:$4 sm:$0xff]   ;;  %v3339_v63 = vld [vmem:[#allocation8 + $0x6e0] ss:$16 sps:$4 sm:$0xff]  }
 0x1ad   :  { %2032 = vmatprep.subr.bf16.mxu0 %v3275_v0  ;;  %2196 = vmatprep.subr.bf16.mxu1 %v3278_v1  ;;  %v3342_v0 = vld [vmem:[#allocation8 + $0x6e8] ss:$16 sps:$4 sm:$0xff]   ;;  %v3347_v1 = vld [vmem:[#allocation8 + $0x704] ss:$16 sps:$4 sm:$0xff]  }
 0x1b0   :  { %2033 = vmatpush1.bf16.msra.mxu0 %v3273_v3  ;;  %2197 = vmatpush1.bf16.msra.mxu1 %v3276_v4  ;;  %v3345_v3 = vld [vmem:[#allocation8 + $0x700] ss:$16 sps:$4 sm:$0xff]   ;;  %v3348_v4 = vld [vmem:[#allocation8 + $0x708] ss:$16 sps:$4 sm:$0xff]  }
 0x1b1   :  { %2034 = vmatprep.subr.bf16.mxu0 %v3281_v5  ;;  %2198 = vmatprep.subr.bf16.mxu1 %v3284_v33  ;;  %v3353_v5 = vld [vmem:[#allocation8 + $0x724] ss:$16 sps:$4 sm:$0xff]   ;;  %v3356_v33 = vld [vmem:[#allocation8 + $0x72c] ss:$16 sps:$4 sm:$0xff]  }
 0x1b4   :  { %2035 = vmatpush1.bf16.msra.mxu0 %v3279_v8  ;;  %2199 = vmatpush1.bf16.msra.mxu1 %v3282_v10  ;;  %v3359_v8 = vld [vmem:[#allocation8 + $0x744] ss:$16 sps:$4 sm:$0xff]   ;;  %v3362_v10 = vld [vmem:[#allocation8 + $0x74c] ss:$16 sps:$4 sm:$0xff]  }
 0x1b5   :  { %2036 = vmatprep.subr.bf16.mxu0 %v3287_v11  ;;  %2200 = vmatprep.subr.bf16.mxu1 %v3290_v52  ;;  %v3357_v11 = vld [vmem:[#allocation8 + $0x740] ss:$16 sps:$4 sm:$0xff]   ;;  %v3360_v52 = vld [vmem:[#allocation8 + $0x748] ss:$16 sps:$4 sm:$0xff]  }
 0x1b8   :  { %2037 = vmatpush1.bf16.msra.mxu0 %v3285_v15  ;;  %2201 = vmatpush1.bf16.msra.mxu1 %v3288_v16  ;;  %v3363_v15 = vld [vmem:[#allocation8 + $0x760] ss:$16 sps:$4 sm:$0xff]   ;;  %v3366_v16 = vld [vmem:[#allocation8 + $0x768] ss:$16 sps:$4 sm:$0xff]  }
 0x1b9   :  { %2038 = vmatprep.subr.bf16.mxu0 %v3293_v17  ;;  %2202 = vmatprep.subr.bf16.mxu1 %v3296_v18  ;;  %v3371_v17 = vld [vmem:[#allocation8 + $0x784] ss:$16 sps:$4 sm:$0xff]   ;;  %v3374_v18 = vld [vmem:[#allocation8 + $0x78c] ss:$16 sps:$4 sm:$0xff]  }
 0x1bc   :  { %2039 = vmatpush1.bf16.msra.mxu0 %v3291_v21  ;;  %2203 = vmatpush1.bf16.msra.mxu1 %v3294_v27  ;;  %v130_v21 = vsub.s32 6, %v3682_v22  ;;  %v3377_v27 = vld [vmem:[#allocation8 + $0x7a4] ss:$16 sps:$4 sm:$0xff]  }
 0x1bd   :  { %2049 = vmatprep.subr.bf16.mxu0 %v3299_v28  ;;  %2213 = vmatprep.subr.bf16.mxu1 %v3302_v29  ;;  %v3380_v28 = vld [vmem:[#allocation8 + $0x7ac] ss:$16 sps:$4 sm:$0xff]   ;;  %v3375_v29 = vld [vmem:[#allocation8 + $0x7a0] ss:$16 sps:$4 sm:$0xff]  }
 0x1bf   :  { %2041 = vmatmul.mubr.bf16.vlgmr.msra.gmra.mrb[8].mxu0 %v364_v30  ;;  %2205 = vmatmul.mubr.bf16.vlgmr.msra.gmra.mrb[8].mxu1 %v364_v30  ;;  %v131_v30 = vrot.slane %v3685_v24, %v130_v21  ;;  %v3393_v24 = vld [vmem:[#allocation10 + $0x40] sm:$0xff]  }
 0x1c0   :  { %2050 = vmatpush1.bf16.msra.mxu0 %v3297_v31  ;;  %2214 = vmatpush1.bf16.msra.mxu1 %v3300_v32  ;;  %v3383_v31 = vld [vmem:[#allocation8 + $0x7c4] ss:$16 sps:$4 sm:$0xff]   ;;  %v3386_v32 = vld [vmem:[#allocation8 + $0x7cc] ss:$16 sps:$4 sm:$0xff]  }
 0x1c1   :  { %2051 = vmatprep.subr.bf16.mxu0 %v3305_v34  ;;  %2215 = vmatprep.subr.bf16.mxu1 %v3308_v35  ;;  %v3381_v34 = vld [vmem:[#allocation8 + $0x7c0] ss:$16 sps:$4 sm:$0xff]   ;;  %v3384_v35 = vld [vmem:[#allocation8 + $0x7c8] ss:$16 sps:$4 sm:$0xff]  }
 0x1c2   :  { %2081 = vmatprep.mubr.bf16.mxu0 %v367_v12  ;;  %2245 = vmatprep.mubr.bf16.mxu1 %v367_v12  ;;  %v346_v12 = vadd.f32 %v3704_v9, %v131_v30  ;;  %v3397_v9 = vld [vmem:[#allocation10 + $0x48] sm:$0xff]  }
 0x1c4   :  { %2052 = vmatpush1.bf16.msra.mxu0 %v3303_v36  ;;  %2216 = vmatpush1.bf16.msra.mxu1 %v3306_v37  ;;  %v3389_v36 = vld [vmem:[#allocation8 + $0x7e4] ss:$16 sps:$4 sm:$0xff]   ;;  %v3392_v37 = vld [vmem:[#allocation8 + $0x7ec] ss:$16 sps:$4 sm:$0xff]  }
 0x1c5   :  { %2053 = vmatprep.subr.bf16.mxu0 %v3311_v38  ;;  %2217 = vmatprep.subr.bf16.mxu1 %v3314_v39  ;;  %v3387_v38 = vld [vmem:[#allocation8 + $0x7e0] ss:$16 sps:$4 sm:$0xff]   ;;  %v3390_v39 = vld [vmem:[#allocation8 + $0x7e8] ss:$16 sps:$4 sm:$0xff]  }
 0x1c8   :  { %2054 = vmatpush1.bf16.msra.mxu0 %v3309_v40  ;;  %2218 = vmatpush1.bf16.msra.mxu1 %v3312_v41  ;;  %v358_v40 = vmax.f32 %v346_v12, 0.0  ;;  %v3394_v41 = vld [vmem:[#allocation10 + $0xc0] sm:$0xff]  }
 0x1c9   :  { %2055 = vmatprep.subr.bf16.mxu0 %v3317_v42  ;;  %2219 = vmatprep.subr.bf16.mxu1 %v3320_v43  ;;  %v3395_v42 = vld [vmem:[#allocation10] sm:$0xff]  }
 0x1ca   :  { %v3396_v43 = vld [vmem:[#allocation10 + $0x80] sm:$0xff]  }
 0x1cc   :  { %2056 = vmatpush1.bf16.msra.mxu0 %v3315_v44  ;;  %2220 = vmatpush1.bf16.msra.mxu1 %v3318_v46  ;;  %v366_v44 = vpack.c.bf16 %v358_v40, %v358_v40  ;;  %v3398_v46 = vld [vmem:[#allocation10 + $0xc8] sm:$0xff]  }
 0x1cd   :  { %2057 = vmatprep.subr.bf16.mxu0 %v3323_v47  ;;  %2221 = vmatprep.subr.bf16.mxu1 %v3326_v48  ;;  %v3399_v47 = vld [vmem:[#allocation10 + $0x8] sm:$0xff]  }
 0x1ce   :  { %v3400_v48 = vld [vmem:[#allocation10 + $0x88] sm:$0xff]  }
 0x1d0   :  { %2058 = vmatpush1.bf16.msra.mxu0 %v3321_v49  ;;  %2222 = vmatpush1.bf16.msra.mxu1 %v3324_v50  ;;  %v3401_v49 = vld [vmem:[#allocation10 + $0x50] sm:$0xff]  }
 0x1d1   :  { %2059 = vmatprep.subr.bf16.mxu0 %v3329_v53  ;;  %2223 = vmatprep.subr.bf16.mxu1 %v3332_v54  ;;  %v3402_v50 = vld [vmem:[#allocation10 + $0xd0] sm:$0xff]  }
 0x1d2   :  { %v3403_v53 = vld [vmem:[#allocation10 + $0x10] sm:$0xff]  }
 0x1d3   :  { %v3404_v54 = vld [vmem:[#allocation10 + $0x90] sm:$0xff]  }
 0x1d4   :  { %2060 = vmatpush1.bf16.msra.mxu0 %v3327_v55  ;;  %2224 = vmatpush1.bf16.msra.mxu1 %v3330_v56  ;;  %v3405_v55 = vld [vmem:[#allocation10 + $0x58] sm:$0xff]  }
 0x1d5   :  { %2061 = vmatprep.subr.bf16.mxu0 %v3335_v57  ;;  %2225 = vmatprep.subr.bf16.mxu1 %v3338_v58  ;;  %v3406_v56 = vld [vmem:[#allocation10 + $0xd8] sm:$0xff]  }
 0x1d6   :  { %v3407_v57 = vld [vmem:[#allocation10 + $0x18] sm:$0xff]  }
 0x1d7   :  { %v3408_v58 = vld [vmem:[#allocation10 + $0x98] sm:$0xff]  }
 0x1d8   :  { %2062 = vmatpush1.bf16.msra.mxu0 %v3333_v59  ;;  %2226 = vmatpush1.bf16.msra.mxu1 %v3336_v60  ;;  %v3409_v59 = vld [vmem:[#allocation10 + $0x60] sm:$0xff]  }
 0x1d9   :  { %2063 = vmatprep.subr.bf16.mxu0 %v3341_v61  ;;  %2227 = vmatprep.subr.bf16.mxu1 %v3344_v62  ;;  %v3410_v60 = vld [vmem:[#allocation10 + $0xe0] sm:$0xff]  }
 0x1da   :  { %v3411_v61 = vld [vmem:[#allocation10 + $0x20] sm:$0xff]  }
 0x1db   :  { %v3412_v62 = vld [vmem:[#allocation10 + $0xa0] sm:$0xff]  }
 0x1dc   :  { %2064 = vmatpush1.bf16.msra.mxu0 %v3339_v63  ;;  %2228 = vmatpush1.bf16.msra.mxu1 %v3342_v0  ;;  %v3413_v63 = vld [vmem:[#allocation10 + $0x68] sm:$0xff]  }
 0x1dd   :  { %2065 = vmatprep.subr.bf16.mxu0 %v3347_v1  ;;  %2229 = vmatprep.subr.bf16.mxu1 %v3350_v2  ;;  %v3414_v0 = vld [vmem:[#allocation10 + $0xe8] sm:$0xff]  }
 0x1de   :  { %v3415_v1 = vld [vmem:[#allocation10 + $0x28] sm:$0xff]  }
 0x1df   :  { %v3416_v2 = vld [vmem:[#allocation10 + $0xa8] sm:$0xff]  }
 0x1e0   :  { %2066 = vmatpush1.bf16.msra.mxu0 %v3345_v3  ;;  %2230 = vmatpush1.bf16.msra.mxu1 %v3348_v4  ;;  %v3417_v3 = vld [vmem:[#allocation10 + $0x70] sm:$0xff]  }
 0x1e1   :  { %2067 = vmatprep.subr.bf16.mxu0 %v3353_v5  ;;  %2231 = vmatprep.subr.bf16.mxu1 %v3356_v33  ;;  %v3418_v4 = vld [vmem:[#allocation10 + $0xf0] sm:$0xff]  }
 0x1e2   :  { %v3419_v5 = vld [vmem:[#allocation10 + $0x30] sm:$0xff]  }
 0x1e3   :  { %v3420_v33 = vld [vmem:[#allocation10 + $0xb0] sm:$0xff]  }
 0x1e4   :  { %2068 = vmatpush1.bf16.msra.mxu0 %v3351_v6  ;;  %2232 = vmatpush1.bf16.msra.mxu1 %v3354_v7  ;;  %v3421_v6 = vld [vmem:[#allocation10 + $0x78] sm:$0xff]  }
 0x1e5   :  { %2069 = vmatprep.subr.bf16.mxu0 %v3359_v8  ;;  %2233 = vmatprep.subr.bf16.mxu1 %v3362_v10  ;;  %v3422_v7 = vld [vmem:[#allocation10 + $0xf8] sm:$0xff]  }
 0x1e6   :  { %v3423_v8 = vld [vmem:[#allocation10 + $0x38] sm:$0xff]  }
 0x1e7   :  { %v3424_v10 = vld [vmem:[#allocation10 + $0xb8] sm:$0xff]  }
 0x1e8   :  { %2070 = vmatpush1.bf16.msra.mxu0 %v3357_v11  ;;  %2234 = vmatpush1.bf16.msra.mxu1 %v3360_v52  ;;  %v624_v11 = vld [vmem:[%s3755_s4] sm:$0xf] }
 0x1e9   :  { %2071 = vmatprep.subr.bf16.mxu0 %v3365_v13  ;;  %2235 = vmatprep.subr.bf16.mxu1 %v3368_v14  ;;  %v629_v52 = vrot.slane %v624_v11, %v106_v23  ;;  %v637_v13 = vrot.slane %v624_v11, %v114_v45  ;;  %v633_v14 = vrot.slane %v624_v11, %v110_v25 }
 0x1ec   :  { %2072 = vmatpush1.bf16.msra.mxu0 %v3363_v15  ;;  %2236 = vmatpush1.bf16.msra.mxu1 %v3366_v16  ;;  %v641_v15 = vrot.slane %v624_v11, %v118_v26 }
 0x1ed   :  { %2073 = vmatprep.subr.bf16.mxu0 %v3371_v17  ;;  %2237 = vmatprep.subr.bf16.mxu1 %v3374_v18 }
 0x1f0   :  { %2074 = vmatpush1.bf16.msra.mxu0 %v3369_v19  ;;  %2238 = vmatpush1.bf16.msra.mxu1 %v3372_v20 }
 0x1f1   :  { %2075 = vmatprep.subr.bf16.mxu0 %v3377_v27  ;;  %2239 = vmatprep.subr.bf16.mxu1 %v3380_v28 }
 0x1f4   :  { %2076 = vmatpush1.bf16.msra.mxu0 %v3375_v29  ;;  %2240 = vmatpush1.bf16.msra.mxu1 %v3378_v51 }
 0x1f5   :  { %2077 = vmatprep.subr.bf16.mxu0 %v3383_v31  ;;  %2241 = vmatprep.subr.bf16.mxu1 %v3386_v32 }
 0x1f8   :  { %2078 = vmatpush1.bf16.msra.mxu0 %v3381_v34  ;;  %2242 = vmatpush1.bf16.msra.mxu1 %v3384_v35 }
 0x1f9   :  { %2079 = vmatprep.subr.bf16.mxu0 %v3389_v36  ;;  %2243 = vmatprep.subr.bf16.mxu1 %v3392_v37  ;;  %v2891_v37 = vld [vmem:[%s3757_s6] ss:$0 sm:$0xff] }
 0x1fc   :  { %2080 = vmatpush1.bf16.msra.mxu0 %v3387_v38  ;;  %2244 = vmatpush1.bf16.msra.mxu1 %v3390_v39 }
 0x1fd   :  { %2924 = vmatprep.subr.bf16.mxu0 %v3393_v24  ;;  %2946 = vmatprep.subr.bf16.mxu1 %v3394_v41 }
 0x1ff   :  { %2082 = vmatmul.mubr.bf16.vlgmr.msra.gmra.mrb[8].mxu0 %v366_v44  ;;  %2246 = vmatmul.mubr.bf16.vlgmr.msra.gmra.mrb[8].mxu1 %v366_v44 }
 0x200   :  { %2925 = vmatpush3.bf16.msra.mxu0 %v3395_v42  ;;  %2947 = vmatpush3.bf16.msra.mxu1 %v3396_v43 }
 0x201   :  { %2926 = vmatprep.subr.bf16.mxu0 %v3397_v9  ;;  %2948 = vmatprep.subr.bf16.mxu1 %v3398_v46 }
 0x204   :  { %2927 = vmatpush3.bf16.msra.mxu0 %v3399_v47  ;;  %2949 = vmatpush3.bf16.msra.mxu1 %v3400_v48 }
 0x205   :  { %2928 = vmatprep.subr.bf16.mxu0 %v3401_v49  ;;  %2950 = vmatprep.subr.bf16.mxu1 %v3402_v50 }
 0x208   :  { %2929 = vmatpush3.bf16.msra.mxu0 %v3403_v53  ;;  %2951 = vmatpush3.bf16.msra.mxu1 %v3404_v54 }
 0x209   :  { %2930 = vmatprep.subr.bf16.mxu0 %v3405_v55  ;;  %2952 = vmatprep.subr.bf16.mxu1 %v3406_v56 }
 0x20c   :  { %2931 = vmatpush3.bf16.msra.mxu0 %v3407_v57  ;;  %2953 = vmatpush3.bf16.msra.mxu1 %v3408_v58 }
 0x20d   :  { %2932 = vmatprep.subr.bf16.mxu0 %v3409_v59  ;;  %2954 = vmatprep.subr.bf16.mxu1 %v3410_v60 }
 0x210   :  { %2933 = vmatpush3.bf16.msra.mxu0 %v3411_v61  ;;  %2955 = vmatpush3.bf16.msra.mxu1 %v3412_v62 }
 0x211   :  { %2934 = vmatprep.subr.bf16.mxu0 %v3413_v63  ;;  %2956 = vmatprep.subr.bf16.mxu1 %v3414_v0 }
 0x214   :  { %2935 = vmatpush3.bf16.msra.mxu0 %v3415_v1  ;;  %2957 = vmatpush3.bf16.msra.mxu1 %v3416_v2 }
 0x215   :  { %2936 = vmatprep.subr.bf16.mxu0 %v3417_v3  ;;  %2958 = vmatprep.subr.bf16.mxu1 %v3418_v4 }
 0x218   :  { %2937 = vmatpush3.bf16.msra.mxu0 %v3419_v5  ;;  %2959 = vmatpush3.bf16.msra.mxu1 %v3420_v33 }
 0x219   :  { %2938 = vmatprep.subr.bf16.mxu0 %v3421_v6  ;;  %2960 = vmatprep.subr.bf16.mxu1 %v3422_v7 }
 0x21c   :  { %2939 = vmatpush3.bf16.msra.mxu0 %v3423_v8  ;;  %2961 = vmatpush3.bf16.msra.mxu1 %v3424_v10 }
 0x2d2   :  { %v2083_v16 = vpop.f32.mrb[8].mxu0  ;;  %v2247_v17 = vpop.f32.mrb[8].mxu1 }
 0x2d3   :  { %v2968_v18 = vadd.f32 %v2083_v16, %v629_v52  ;;  %v2970_v19 = vadd.f32 %v2247_v17, %v637_v13  ;;  %v2085_v20 = vpop.f32.mrb[9].mxu0  ;;  %v2249_v21 = vpop.f32.mrb[9].mxu1 }
 0x2d4   :  { %v2969_v27 = vadd.f32 %v2085_v20, %v633_v14  ;;  %v2971_v28 = vadd.f32 %v2249_v21, %v641_v15  ;;  %v2087_v29 = vpop.f32.mrb[10].mxu0  ;;  %v2251_v51 = vpop.f32.mrb[10].mxu1 }
 0x2d5   :  { %v2254_v23 = vmax.f32 %v2968_v18, 0.0  ;;  %v2256_v30 = vmax.f32 %v2970_v19, 0.0  ;;  %v2088_v31 = vpop.f32.mrb[11].mxu0  ;;  %v2252_v45 = vpop.f32.mrb[11].mxu1 }
 0x2d6   :  { %v2255_v32 = vmax.f32 %v2969_v27, 0.0  ;;  %v2257_v34 = vmax.f32 %v2971_v28, 0.0 }
 0x2d7   :  { %v2258_v22 = vpack.c.bf16 %v2254_v23, %v2254_v23  ;;  %v2260_v26 = vpack.c.bf16 %v2256_v30, %v2256_v30 }
 0x2d8   :  { %v2259_v25 = vpack.c.bf16 %v2255_v32, %v2255_v32  ;;  %v2261_v35 = vpack.c.bf16 %v2257_v34, %v2257_v34 }
 0x2da   :  { %2557 = vmatprep.mubr.bf16.mxu0 %v2259_v25  ;;  %2597 = vmatprep.mubr.bf16.mxu1 %v2261_v35 }
 0x2db   :  { %2558 = vmatmul.mubr.bf16.vlgmr.msra.gmra.mrb[12].mxu0 %v2258_v22  ;;  %2598 = vmatmul.mubr.bf16.vlgmr.msra.gmra.mrb[12].mxu1 %v2260_v26 }
 0x3ae   :  { %v2940_v12 = vpop.f32.mrb[12].mxu0  ;;  %v2962_v36 = vpop.f32.mrb[12].mxu1 }
 0x3af   :  { %v2941_v38 = vpop.f32.mrb[13].mxu0  ;;  %v2963_v39 = vpop.f32.mrb[13].mxu1 }
 0x3b0   :  { %v2942_v40 = vadd.f32 %v2941_v38, %v2940_v12  ;;  %v2964_v24 = vadd.f32 %v2963_v39, %v2962_v36  ;;  %v2943_v41 = vpop.f32.mrb[14].mxu0  ;;  %v2965_v42 = vpop.f32.mrb[14].mxu1 }
 0x3b1   :  { %v2944_v43 = vpop.f32.mrb[15].mxu0  ;;  %v2966_v44 = vpop.f32.mrb[15].mxu1 }
 0x3b2   :  { %v2560_v9 = vadd.f32 %v2942_v40, %v2891_v37 }
 0x3b4   :  { %v2600_v46 = vadd.f32 %v2964_v24, %v2560_v9 }
 0x3b6   :  { %2605 = vst [vmem:[#allocation11] sm:$0x3] %v2600_v46 }
 0x3b7   :  { %3546 = shalt.err (!%p3543_p2)
}
 0x3b8   :  { %s3547_s21 = scalar_lea.hbm %s3758_s7, 32 }
 0x3b9   :  { %p3548_p3 = scmp.ne.s32.totalorder %s3758_s7, %s3547_s21  ;;  %p3551_p4 = scmp.lt.u32.totalorder %s3547_s21, %s3758_s7 }
 0x3bb   :  { %p3553_p5 = pnand %p3551_p4, %p3548_p3 }
 0x3bd   :  { %3556 = shalt.err (!%p3553_p5)
}
 0x3be   :  { %2615 = dma.vmem_to_hbm [thread:$0]  %s2613_s18, 32, %s3758_s7, [#allocation4]  }
 0x3bf   :  { %3563 = dma.done.wait [#allocation4], 32  }
 0x3c0   :  { %3564 = vsyncadd [#allocation4], 4294967264 }
 0x3c1   :  { %2619 = vsyncpa [#allocation3], 1 }
 0x3c2   :  { %2620 = vsyncpa [#allocation6], 1 }
 0x3c3   :  { %2621 = vsyncpa [#allocation9], 1 }
 0x3c4   :  { %2622 = vsyncpa [#allocation4], 1 }

</bundles_post_ra>
